<compile_context>
chip_gen: v7x
topology: tpu7x:2x2x1
jax: 0.10.0
libtpu: 0.0.40
codegen_flags: <defaults>
</compile_context>

<pallas_src>
import functools

import jax
import jax.numpy as jnp
from jax.experimental import pallas as pl
from jax.experimental.pallas import tpu as pltpu

HIDDEN = 1000     # fixed by the module definition
HP = 1024         # HIDDEN padded to a lane multiple
H_CHUNK = 512     # hidden dim processed in chunks of 512 inside the kernel


def _round_up(n, m):
    return ((n + m - 1) // m) * m


def _dtype_bytes(dt):
    return jnp.dtype(dt).itemsize


# ---------------------------------------------------------------------------
# One-time hardware / capability probes
# ---------------------------------------------------------------------------

def _vmem_capacity_bytes():
    try:  # capability probe only
        cap = getattr(pltpu.get_tpu_info(), "vmem_capacity_bytes", None)
        if cap:
            return int(cap)
    except Exception:
        pass
    return 64 << 20  # conservative default = v7x per-TensorCore VMEM


_VMEM_CAP = _vmem_capacity_bytes()
_VMEM_LIMIT_CEIL = int(_VMEM_CAP * 0.85)   # headroom for compiler-internal scratch
_RESIDENT_BUDGET = int(_VMEM_CAP * 0.60)   # gate for keeping W1 fully resident


def _is_v5():
    try:  # capability probe only
        return "v5" in jax.devices()[0].device_kind.lower()
    except Exception:
        return False


_IS_V5 = _is_v5()


@functools.lru_cache(maxsize=None)
def _single_buffer_supported():
    """One-time capability probe: resident inputs with pipeline_mode=Buffered(1)."""
    def _probe_kernel(a_ref, o_ref):
        o_ref[...] = a_ref[...] * 2.0

    try:  # capability probe only; real kernels never rely on this except
        kw = dict(pipeline_mode=pl.Buffered(1))
        fn = pl.pallas_call(
            _probe_kernel,
            out_shape=jax.ShapeDtypeStruct((16, 128), jnp.float32),
            grid_spec=pltpu.PrefetchScalarGridSpec(
                num_scalar_prefetch=0,
                grid=(2,),
                in_specs=[pl.BlockSpec((8, 128), lambda i: (0, 0), **kw)],
                out_specs=pl.BlockSpec((8, 128), lambda i: (i, 0)),
            ),
        )
        jax.block_until_ready(fn(jnp.ones((8, 128), jnp.float32)))
        return True
    except Exception:
        return False


def _resident_spec_kwargs():
    if _single_buffer_supported():
        return dict(pipeline_mode=pl.Buffered(1))
    return {}


# ---------------------------------------------------------------------------
# Kernels
# ---------------------------------------------------------------------------

def _fcnet_kernel_resident(x_ref, w1_ref, b1_ref, w2_ref, b2_ref, o_ref, *, h_chunk):
    # x_ref:(tb, D) f32 | w1_ref:(D, Hp) bf16 | b1_ref:(1, Hp) f32
    # w2_ref:(Hp, Cp) bf16 | b2_ref:(1, Cp) f32 | o_ref:(tb, Cp)
    x = x_ref[...].astype(jnp.bfloat16)          # in-kernel cast: x read once from HBM
    tb = x_ref.shape[0]
    hp = w1_ref.shape[1]
    cp = o_ref.shape[1]
    acc = jnp.zeros((tb, cp), jnp.float32)
    # Hidden dim in chunks: halves the live f32 hidden slab and lets the VPU
    # epilogue of one chunk overlap the MXU work of the next.
    for h0 in range(0, hp, h_chunk):
        h = jnp.dot(x, w1_ref[:, h0:h0 + h_chunk],
                    preferred_element_type=jnp.float32)
        h = jnp.maximum(h + b1_ref[:, h0:h0 + h_chunk], 0.0).astype(jnp.bfloat16)
        acc = acc + jnp.dot(h, w2_ref[h0:h0 + h_chunk, :],
                            preferred_element_type=jnp.float32)
    o_ref[...] = (acc + b2_ref[...]).astype(o_ref.dtype)


def _fcnet_kernel_ktiled(x_ref, w1_ref, b1_ref, w2_ref, b2_ref, o_ref, h_acc, *, h_chunk):
    # Grid = (batch tiles, K tiles).  W1 streamed in (tk, Hp) slices; hidden
    # pre-activation accumulated in f32 VMEM scratch; epilogue at the last K step.
    k = pl.program_id(1)

    @pl.when(k == 0)
    def _():
        h_acc[...] = jnp.zeros_like(h_acc)

    x = x_ref[...].astype(jnp.bfloat16)
    h_acc[...] += jnp.dot(x, w1_ref[...], preferred_element_type=jnp.float32)

    @pl.when(k == pl.num_programs(1) - 1)
    def _():
        tb = x_ref.shape[0]
        hp = w2_ref.shape[0]
        cp = o_ref.shape[1]
        acc = jnp.zeros((tb, cp), jnp.float32)
        for h0 in range(0, hp, h_chunk):
            h = jnp.maximum(h_acc[:, h0:h0 + h_chunk] + b1_ref[:, h0:h0 + h_chunk], 0.0)
            acc = acc + jnp.dot(h.astype(jnp.bfloat16), w2_ref[h0:h0 + h_chunk, :],
                                preferred_element_type=jnp.float32)
        o_ref[...] = (acc + b2_ref[...]).astype(o_ref.dtype)


# ---------------------------------------------------------------------------
# Parameter preparation (hoisted out of the per-call forward path)
# ---------------------------------------------------------------------------

def prepare_fcnet_params(w1, b1, w2, b2, *, tk=512, force_ktile=False):
    """Pad + cast the weights ONCE.  Returns a dict consumed by fcnet_forward.

    Zero padding is numerically exact (padded rows/cols contribute 0; padded
    outputs are sliced away).  Large-D shapes get a K-tiled (streamed W1)
    layout; otherwise W1 stays fully resident in VMEM.
    """
    D, H = w1.shape
    C = w2.shape[1]
    assert H == HIDDEN and w2.shape[0] == HIDDEN, "fcnet hidden size is fixed at 1000"
    Hp = HP
    Cp = _round_up(max(C, 1), 128)

    b1 = jnp.reshape(b1, (1, H))
    b2 = jnp.reshape(b2, (1, C))

    # Residency decision from a worst-case (tb=256) VMEM footprint.
    wbuf = 1 if _single_buffer_supported() else 2
    tb_est = 256
    resident_need = (
        2 * tb_est * D * 4                                     # f32 x tiles (dbl buf)
        + 2 * tb_est * Cp * 4                                  # output tiles
        + (D * Hp * 2 + Hp * 4 + Hp * Cp * 2 + Cp * 4) * wbuf  # resident weights
        + tb_est * D * 2                                       # bf16 copy of x
        + tb_est * H_CHUNK * 6                                 # live f32+bf16 hidden chunk
        + tb_est * Cp * 4)                                     # f32 output accumulator
    use_ktile = bool(force_ktile or resident_need > _RESIDENT_BUDGET)

    if use_ktile:
        tk = max(128, _round_up(min(tk, _round_up(D, 128)), 128))
        Dp = _round_up(D, tk)
        w1p = jnp.pad(w1, ((0, Dp - D), (0, Hp - H))).astype(jnp.bfloat16)
    else:
        tk = None
        Dp = D  # resident path: full-D block, no x / W1 padding on D
        w1p = jnp.pad(w1, ((0, 0), (0, Hp - H))).astype(jnp.bfloat16)

    b1p = jnp.pad(b1, ((0, 0), (0, Hp - H))).astype(jnp.float32)
    w2p = jnp.pad(w2, ((0, Hp - H), (0, Cp - C))).astype(jnp.bfloat16)
    b2p = jnp.pad(b2, ((0, 0), (0, Cp - C))).astype(jnp.float32)

    return dict(w1=w1p, b1=b1p, w2=w2p, b2=b2p,
                D=D, Dp=Dp, C=C, Cp=Cp, use_ktile=use_ktile, tk=tk)


# ---------------------------------------------------------------------------
# Forward
# ---------------------------------------------------------------------------

def fcnet_forward(x, params, *, tb=None):
    """relu(x @ W1 + b1) @ W2 + b2 with eval-mode dropout (identity)."""
    B, D = x.shape
    assert D == params["D"], "input dim does not match prepared params"
    out_dtype = x.dtype

    if tb is None:
        tb = 128 if (B <= 128 or _IS_V5) else 256
    tb = max(128, _round_up(tb, 128))

    Dp, C, Cp = params["Dp"], params["C"], params["Cp"]
    Bp = _round_up(B, tb)
    n_btiles = Bp // tb

    # Only shard the batch grid across TensorCores when there are enough tiles
    # to amortize duplicated weight fetches (relevant on v7x's 2 TCs).
    batch_sem = "parallel" if n_btiles >= 4 else "arbitrary"

    xp = x
    if Bp != B or Dp != D:
        xp = jnp.pad(x, ((0, Bp - B), (0, Dp - D)))   # stays f32; bf16 cast is in-kernel

    flops = 2 * Bp * (Dp * HP + HP * Cp)
    bytes_accessed = (xp.size * _dtype_bytes(xp.dtype)
                      + params["w1"].size * 2 + params["b1"].size * 4
                      + params["w2"].size * 2 + params["b2"].size * 4
                      + Bp * Cp * _dtype_bytes(out_dtype))
    cost = pl.CostEstimate(flops=flops, transcendentals=0,
                           bytes_accessed=bytes_accessed)

    def run(resident_kw):
        wbuf = 1 if resident_kw else 2
        if params["use_ktile"]:
            tk = params["tk"]
            grid = (n_btiles, Dp // tk)
            in_specs = [
                pl.BlockSpec((tb, tk), lambda i, k: (i, k)),                  # x (f32)
                pl.BlockSpec((tk, HP), lambda i, k: (k, 0)),                  # W1 streamed
                pl.BlockSpec((1, HP), lambda i, k: (0, 0), **resident_kw),    # b1
                pl.BlockSpec((HP, Cp), lambda i, k: (0, 0), **resident_kw),   # W2
                pl.BlockSpec((1, Cp), lambda i, k: (0, 0), **resident_kw),    # b2
            ]
            out_spec = pl.BlockSpec((tb, Cp), lambda i, k: (i, 0))
            scratch = [pltpu.VMEM((tb, HP), jnp.float32)]
            kernel = functools.partial(_fcnet_kernel_ktiled, h_chunk=H_CHUNK)
            sem = (batch_sem, "arbitrary")
            need = (2 * tb * tk * 4 + 2 * tk * HP * 2
                    + (HP * 4 + HP * Cp * 2 + Cp * 4) * wbuf
                    + 2 * tb * Cp * _dtype_bytes(out_dtype)
                    + tb * HP * 4
                    + tb * (tk + H_CHUNK) * 2 + tb * H_CHUNK * 4 + tb * Cp * 4)
        else:
            grid = (n_btiles,)
            in_specs = [
                pl.BlockSpec((tb, Dp), lambda i: (i, 0)),                     # x (f32, full D)
                pl.BlockSpec((Dp, HP), lambda i: (0, 0), **resident_kw),      # W1 resident
                pl.BlockSpec((1, HP), lambda i: (0, 0), **resident_kw),       # b1
                pl.BlockSpec((HP, Cp), lambda i: (0, 0), **resident_kw),      # W2
                pl.BlockSpec((1, Cp), lambda i: (0, 0), **resident_kw),       # b2
            ]
            out_spec = pl.BlockSpec((tb, Cp), lambda i: (i, 0))
            scratch = []
            kernel = functools.partial(_fcnet_kernel_resident, h_chunk=H_CHUNK)
            sem = (batch_sem,)
            need = (2 * tb * Dp * 4 + 2 * tb * Cp * _dtype_bytes(out_dtype)
                    + (Dp * HP * 2 + HP * 4 + HP * Cp * 2 + Cp * 4) * wbuf
                    + tb * Dp * 2 + tb * H_CHUNK * 6 + tb * Cp * 4)

        vmem_limit = int(min(max(int(need * 1.25) + (4 << 20), 16 << 20),
                             _VMEM_LIMIT_CEIL))

        call = pl.pallas_call(
            kernel,
            out_shape=jax.ShapeDtypeStruct((Bp, Cp), out_dtype),
            grid_spec=pltpu.PrefetchScalarGridSpec(
                num_scalar_prefetch=0,
                grid=grid,
                in_specs=in_specs,
                out_specs=out_spec,
                scratch_shapes=scratch,
            ),
            compiler_params=pltpu.CompilerParams(
                dimension_semantics=sem,
                vmem_limit_bytes=vmem_limit,
            ),
            cost_estimate=cost,
        )
        return call(xp, params["w1"], params["b1"], params["w2"], params["b2"])

    resident_kw = _resident_spec_kwargs()
    if resident_kw:
        try:
            out = run(resident_kw)
        except pltpu.LoweringException:
            # Narrow fallback: single-buffered residency rejected by this
            # lowering -> default double buffering.  Other errors propagate.
            out = run({})
    else:
        out = run({})

    return out[:B, :C]


# ---------------------------------------------------------------------------
# Deterministic init (PyTorch Linear style) + self-test
# ---------------------------------------------------------------------------

def init_params(key, dim, n_classes):
    k1, k2, k3, k4 = jax.random.split(key, 4)
    bound1 = 1.0 / jnp.sqrt(dim)
    bound2 = 1.0 / jnp.sqrt(HIDDEN)
    w1 = jax.random.uniform(k1, (dim, HIDDEN), jnp.float32, -bound1, bound1)
    b1 = jax.random.uniform(k2, (1, HIDDEN), jnp.float32, -bound1, bound1)
    w2 = jax.random.uniform(k3, (HIDDEN, n_classes), jnp.float32, -bound2, bound2)
    b2 = jax.random.uniform(k4, (1, n_classes), jnp.float32, -bound2, bound2)
    return w1, b1, w2, b2


if __name__ == "__main__":
    key = jax.random.PRNGKey(0)
    kx, kp, kx2 = jax.random.split(key, 3)

    # Small shapes: batch=8, dim=32, n_classes=10 (HIDDEN=1000 fixed by the module).
    B, D, C = 8, 32, 10
    x = jax.random.normal(kx, (B, D), jnp.float32)
    w1, b1, w2, b2 = init_params(kp, D, C)

    params = prepare_fcnet_params(w1, b1, w2, b2)   # pad/cast once (hoisted)
    out = jax.block_until_ready(fcnet_forward(x, params))
    assert out.shape == (B, C)

    # Reference with the same bf16-matmul / f32-accumulate arithmetic.
    def ref_fn(xv, w1v, b1v, w2v, b2v):
        h = jnp.dot(xv.astype(jnp.bfloat16), w1v.astype(jnp.bfloat16),
                    preferred_element_type=jnp.float32) + b1v.reshape(1, -1)
        h = jnp.maximum(h, 0.0).astype(jnp.bfloat16)
        return jnp.dot(h, w2v.astype(jnp.bfloat16),
                       preferred_element_type=jnp.float32) + b2v.reshape(1, -1)

    ref = ref_fn(x, w1, b1, w2, b2)
    assert jnp.allclose(out, ref, atol=1e-3, rtol=1e-3)

    # Pure-f32 reference (eval-mode dropout == identity); looser tol (bf16 matmuls).
    ref_f32 = jnp.maximum(x @ w1 + b1.reshape(1, -1), 0.0) @ w2 + b2.reshape(1, -1)
    assert jnp.allclose(out, ref_f32, atol=5e-2, rtol=5e-2)

    # Ragged batch exercises the batch-padding path with the same prepared params.
    x2 = jax.random.normal(jax.random.PRNGKey(1), (10, D), jnp.float32)
    out2 = jax.block_until_ready(fcnet_forward(x2, params))
    assert out2.shape == (10, C)
    assert jnp.allclose(out2, ref_fn(x2, w1, b1, w2, b2), atol=1e-3, rtol=1e-3)

    # Exercise the K-tiled (streamed W1) path across multiple K tiles.
    D2 = 300
    w1b, b1b, w2b, b2b = init_params(jax.random.PRNGKey(7), D2, C)
    params_kt = prepare_fcnet_params(w1b, b1b, w2b, b2b, tk=128, force_ktile=True)
    x3 = jax.random.normal(kx2, (5, D2), jnp.float32)
    out3 = jax.block_until_ready(fcnet_forward(x3, params_kt))
    assert out3.shape == (5, C)
    assert jnp.allclose(out3, ref_fn(x3, w1b, b1b, w2b, b2b), atol=1e-3, rtol=1e-3)

    print("KERNEL_OK")
</pallas_src>

<mosaic_0001>
module attributes {stable_mosaic.version = 11 : i64} {
  func.func @_probe_kernel(%arg0: i32, %arg1: memref<8x128xf32, #tpu.memory_space<vmem>>, %arg2: memref<8x128xf32, #tpu.memory_space<vmem>>) attributes {dimension_semantics = [#tpu.dimension_semantics<arbitrary>], iteration_bounds = array<i64: 2>, scalar_prefetch = 0 : i64, scratch_operands = 0 : i64, tpu.core_type = #tpu.core_type<tc>, window_params = [{pipeline_mode = #tpu.pipeline_mode<synchronous>, transform_indices = @transform_0, window_bounds = array<i64: 8, 128>}, {transform_indices = @transform_1, window_bounds = array<i64: 8, 128>}]} {
    %c0 = arith.constant 0 : index
    %c0_0 = arith.constant 0 : index
    %0 = vector.load %arg1[%c0, %c0_0] : memref<8x128xf32, #tpu.memory_space<vmem>>, vector<8x128xf32>
    %cst = arith.constant 2.000000e+00 : f32
    %1 = vector.broadcast %cst : f32 to vector<8x128xf32>
    %2 = arith.mulf %0, %1 : vector<8x128xf32>
    %c0_1 = arith.constant 0 : index
    %c0_2 = arith.constant 0 : index
    %3 = vector.load %arg2[%c0_1, %c0_2] : memref<8x128xf32, #tpu.memory_space<vmem>>, vector<8x128xf32>
    tpu.vector_store %arg2[%c0_1, %c0_2], %2 {strides = array<i32>} : memref<8x128xf32, #tpu.memory_space<vmem>>, vector<8x128xf32>,
    return
  }
  func.func @transform_0(%arg0: i32) -> (i32, i32) {
    %c0_i32 = arith.constant 0 : i32
    %c0_i32_0 = arith.constant 0 : i32
    %c0_i32_1 = arith.constant 0 : i32
    return %c0_i32, %c0_i32_0 : i32, i32
  }
  func.func @transform_1(%arg0: i32) -> (i32, i32) {
    %c0_i32 = arith.constant 0 : i32
    %c0_i32_0 = arith.constant 0 : i32
    return %arg0, %c0_i32 : i32, i32
  }
}

module attributes {stable_mosaic.version = 11 : i64} {
  func.func @_fcnet_kernel_resident(%arg0: i32, %arg1: memref<128x32xf32, #tpu.memory_space<vmem>>, %arg2: memref<32x1024xbf16, #tpu.memory_space<vmem>>, %arg3: memref<1x1024xf32, #tpu.memory_space<vmem>>, %arg4: memref<1024x128xbf16, #tpu.memory_space<vmem>>, %arg5: memref<1x128xf32, #tpu.memory_space<vmem>>, %arg6: memref<128x128xf32, #tpu.memory_space<vmem>>) attributes {dimension_semantics = [#tpu.dimension_semantics<arbitrary>], iteration_bounds = array<i64: 1>, scalar_prefetch = 0 : i64, scratch_operands = 0 : i64, tpu.core_type = #tpu.core_type<tc>, window_params = [{transform_indices = @transform_0, window_bounds = array<i64: 128, 32>}, {pipeline_mode = #tpu.pipeline_mode<synchronous>, transform_indices = @transform_1, window_bounds = array<i64: 32, 1024>}, {pipeline_mode = #tpu.pipeline_mode<synchronous>, transform_indices = @transform_2, window_bounds = array<i64: 1, 1024>}, {pipeline_mode = #tpu.pipeline_mode<synchronous>, transform_indices = @transform_3, window_bounds = array<i64: 1024, 128>}, {pipeline_mode = #tpu.pipeline_mode<synchronous>, transform_indices = @transform_4, window_bounds = array<i64: 1, 128>}, {transform_indices = @transform_5, window_bounds = array<i64: 128, 128>}]} {
    %c0 = arith.constant 0 : index
    %c0_0 = arith.constant 0 : index
    %0 = vector.load %arg1[%c0, %c0_0] : memref<128x32xf32, #tpu.memory_space<vmem>>, vector<128x32xf32>
    %1 = arith.truncf %0 : vector<128x32xf32> to vector<128x32xbf16>
    %cst = arith.constant 0.000000e+00 : f32
    %2 = vector.broadcast %cst : f32 to vector<128x128xf32>
    %c0_1 = arith.constant 0 : index
    %c0_2 = arith.constant 0 : index
    %3 = vector.load %arg2[%c0_1, %c0_2] : memref<32x1024xbf16, #tpu.memory_space<vmem>>, vector<32x512xbf16>
    %cst_3 = arith.constant dense<0.000000e+00> : vector<128x512xf32>
    %4 = tpu.matmul %1, %3, %cst_3 {dimension_numbers = #tpu.dot_dimension_numbers<[1], [0], [0], [1], [0, 0, 1, 1], [], []>} : vector<128x32xbf16>, vector<32x512xbf16>, vector<128x512xf32> -> vector<128x512xf32>
    %c0_4 = arith.constant 0 : index
    %c0_5 = arith.constant 0 : index
    %5 = vector.load %arg3[%c0_4, %c0_5] : memref<1x1024xf32, #tpu.memory_space<vmem>>, vector<1x512xf32>
    %6 = vector.broadcast %5 : vector<1x512xf32> to vector<128x512xf32>
    %7 = arith.addf %4, %6 : vector<128x512xf32>
    %cst_6 = arith.constant 0.000000e+00 : f32
    %8 = vector.broadcast %cst_6 : f32 to vector<128x512xf32>
    %9 = arith.maximumf %7, %8 : vector<128x512xf32>
    %10 = arith.truncf %9 : vector<128x512xf32> to vector<128x512xbf16>
    %c0_7 = arith.constant 0 : index
    %c0_8 = arith.constant 0 : index
    %11 = vector.load %arg4[%c0_7, %c0_8] : memref<1024x128xbf16, #tpu.memory_space<vmem>>, vector<512x128xbf16>
    %cst_9 = arith.constant dense<0.000000e+00> : vector<128x128xf32>
    %12 = tpu.matmul %10, %11, %cst_9 {dimension_numbers = #tpu.dot_dimension_numbers<[1], [0], [0], [1], [0, 0, 1, 1], [], []>} : vector<128x512xbf16>, vector<512x128xbf16>, vector<128x128xf32> -> vector<128x128xf32>
    %13 = arith.addf %2, %12 : vector<128x128xf32>
    %c0_10 = arith.constant 0 : index
    %c512 = arith.constant 512 : index
    %14 = vector.load %arg2[%c0_10, %c512] : memref<32x1024xbf16, #tpu.memory_space<vmem>>, vector<32x512xbf16>
    %cst_11 = arith.constant dense<0.000000e+00> : vector<128x512xf32>
    %15 = tpu.matmul %1, %14, %cst_11 {dimension_numbers = #tpu.dot_dimension_numbers<[1], [0], [0], [1], [0, 0, 1, 1], [], []>} : vector<128x32xbf16>, vector<32x512xbf16>, vector<128x512xf32> -> vector<128x512xf32>
    %c0_12 = arith.constant 0 : index
    %c512_13 = arith.constant 512 : index
    %16 = vector.load %arg3[%c0_12, %c512_13] : memref<1x1024xf32, #tpu.memory_space<vmem>>, vector<1x512xf32>
    %17 = vector.broadcast %16 : vector<1x512xf32> to vector<128x512xf32>
    %18 = arith.addf %15, %17 : vector<128x512xf32>
    %cst_14 = arith.constant 0.000000e+00 : f32
    %19 = vector.broadcast %cst_14 : f32 to vector<128x512xf32>
    %20 = arith.maximumf %18, %19 : vector<128x512xf32>
    %21 = arith.truncf %20 : vector<128x512xf32> to vector<128x512xbf16>
    %c512_15 = arith.constant 512 : index
    %c0_16 = arith.constant 0 : index
    %22 = vector.load %arg4[%c512_15, %c0_16] : memref<1024x128xbf16, #tpu.memory_space<vmem>>, vector<512x128xbf16>
    %cst_17 = arith.constant dense<0.000000e+00> : vector<128x128xf32>
    %23 = tpu.matmul %21, %22, %cst_17 {dimension_numbers = #tpu.dot_dimension_numbers<[1], [0], [0], [1], [0, 0, 1, 1], [], []>} : vector<128x512xbf16>, vector<512x128xbf16>, vector<128x128xf32> -> vector<128x128xf32>
    %24 = arith.addf %13, %23 : vector<128x128xf32>
    %c0_18 = arith.constant 0 : index
    %c0_19 = arith.constant 0 : index
    %25 = vector.load %arg5[%c0_18, %c0_19] : memref<1x128xf32, #tpu.memory_space<vmem>>, vector<1x128xf32>
    %26 = vector.broadcast %25 : vector<1x128xf32> to vector<128x128xf32>
    %27 = arith.addf %24, %26 : vector<128x128xf32>
    %c0_20 = arith.constant 0 : index
    %c0_21 = arith.constant 0 : index
    %28 = vector.load %arg6[%c0_20, %c0_21] : memref<128x128xf32, #tpu.memory_space<vmem>>, vector<128x128xf32>
    tpu.vector_store %arg6[%c0_20, %c0_21], %27 {strides = array<i32>} : memref<128x128xf32, #tpu.memory_space<vmem>>, vector<128x128xf32>,
    return
  }
  func.func @transform_0(%arg0: i32) -> (i32, i32) {
    %c0_i32 = arith.constant 0 : i32
    %c0_i32_0 = arith.constant 0 : i32
    return %arg0, %c0_i32 : i32, i32
  }
  func.func @transform_1(%arg0: i32) -> (i32, i32) {
    %c0_i32 = arith.constant 0 : i32
    %c0_i32_0 = arith.constant 0 : i32
    %c0_i32_1 = arith.constant 0 : i32
    return %c0_i32, %c0_i32_0 : i32, i32
  }
  func.func @transform_2(%arg0: i32) -> (i32, i32) {
    %c0_i32 = arith.constant 0 : i32
    %c0_i32_0 = arith.constant 0 : i32
    %c0_i32_1 = arith.constant 0 : i32
    return %c0_i32, %c0_i32_0 : i32, i32
  }
  func.func @transform_3(%arg0: i32) -> (i32, i32) {
    %c0_i32 = arith.constant 0 : i32
    %c0_i32_0 = arith.constant 0 : i32
    %c0_i32_1 = arith.constant 0 : i32
    return %c0_i32, %c0_i32_0 : i32, i32
  }
  func.func @transform_4(%arg0: i32) -> (i32, i32) {
    %c0_i32 = arith.constant 0 : i32
    %c0_i32_0 = arith.constant 0 : i32
    %c0_i32_1 = arith.constant 0 : i32
    return %c0_i32, %c0_i32_0 : i32, i32
  }
  func.func @transform_5(%arg0: i32) -> (i32, i32) {
    %c0_i32 = arith.constant 0 : i32
    %c0_i32_0 = arith.constant 0 : i32
    return %arg0, %c0_i32 : i32, i32
  }
}

</mosaic_0001>

<bundles_post_ra>
// kernel: tpu_custom_call.1
= control target key start
LH: loop header
LB: loop body
LE: loop exit
PB: predicated region body
PF: predicated region fallthrough
CT: control target
= control target key end

     0   :  { %6 = vsyncpa [#allocation3], 0  ;;  %s482_s0 = inlined_call_operand.hbm [shape: f32[8,128], index: 0, kind: input, shape index: {}]   ;;  %s483_s1 = inlined_call_operand.hbm [shape: f32[16,128], index: 1, kind: output, shape index: {}]  }
   0x1   :  { %7 = vsyncpa [#allocation4], 0 }
   0x2   :  { %9 = vsyncpa [#allocation4 + $0x1], 0  ;;  %s352_s6 = smov 0   ;;  %s354_s7 = smov 0  }
   0x3   :  { %s356_s8 = smov 0   ;;  %s358_s9 = smov 0  }
   0x4 LB: > { %s373_s10 = sadd.s32 4294967295, %s338_s9   ;;  %s184_s11 = sadd.s32 4294967294, %s338_s9   ;;  %s338_s9 = sphi %s358_s9, %s499_s9   ;;  %s334_s8 = sphi %s356_s8, %s498_s8   ;;  %s330_s7 = sphi %s354_s7, %s497_s7   ;;  %s326_s6 = sphi %s352_s6, %s496_s6  }
   0x5   : > { %s377_s12 = sadd.s32 1, %s338_s9   ;;  %s43_s13 = sadd.s32 1, %s334_s8 }
   0x6   : > { %s40_s14 = ssub.s32 %s338_s9, %s377_s12  ;;  %p53_p0 = scmp.ne.s32.totalorder %s334_s8, %s330_s7 }
   0x7   : > { %p41_p1 = scmp.eq.s32.totalorder %s40_s14, 0  ;;  %p54_p2 = scmp.eq.s32.totalorder %s373_s10, 1 }
   0x8   : > { %p59_p3 = scmp.ne.s32.totalorder %s330_s7, %s326_s6  ;;  %p60_p4 = scmp.eq.s32.totalorder %s184_s11, 1 }
   0x9   : > { %s388_s15 = scalar_select %p41_p1, %s334_s8, %s43_s13  }
   0xa   : > { %p390_p5 = por %p54_p2, %p53_p0  ;;  %p394_p6 = por %p60_p4, %p59_p3 }
   0xb   : > { %p185_p7 = scmp.ge.s32.totalorder %s338_s9, 1  ;;  %p67_p8 = scmp.lt.s32.totalorder %s338_s9, 3 }
   0xc   : > { %s487_s16 = scalar_select %p390_p5, 1, 0 }
   0xd   : > { %s488_s17 = scalar_select %p394_p6, 1, 0 }
   0xe   : > { %p484_p9 = scmp.eq.s32.totalorder %s373_s10, 0  ;;  %p401_p10 = pnand %p185_p7, %p67_p8 }
   0xf   : > { %s340_s19 = smov [#allocation2]   ;;  %s244_s24 = scalar_lea.hbm %s482_s0, 128 }
  0x10   : > { %s489_s18 = scalar_select %p401_p10, 1, 0 }
  0x11   : > { %s80_s20 = sshll.u32 %s340_s19, 4  ;;  %p200_p11 = pneg %p401_p10  ;;  %s81_s20 = int_to_ptr.vmem [resolvable:$true] %s80_s20 }
  0x12   : > { %p245_p13 = scmp.ne.s32.totalorder %s482_s0, %s244_s24  ;;  %p251_p3 = scmp.lt.u32.totalorder %s244_s24, %s482_s0 }
  0x13   : > { %p409_p12 = pnand %p484_p9, %p200_p11 }
  0x15   : > { %p246_p0 = pneg %p409_p12 }
  0x17   : > { %p247_p1 = pnand %p246_p0, %p245_p13 }
  0x19   : > { %p248_p2 = pneg %p247_p1 }
  0x1b   : > { %p253_p4 = pnand %p251_p3, %p248_p2 }
  0x1d   : > { %256 = shalt.err (!%p253_p4)
}
  0x1e   : > { %s257_s29 = scalar_lea.vmem %s81_s20, 128  ;;  %p265_p9 = scmp.lt.s32.totalorder %s81_s20, %s81_s20 }
  0x1f   : > { %p258_p7 = scmp.ne.s32.totalorder %s81_s20, %s257_s29  ;;  %p266_p6 = scmp.lt.s32.totalorder %s257_s29, %s257_s29 }
  0x21   : > { %p260_p8 = pnand %p258_p7, %p246_p0  ;;  %p267_p5 = por %p266_p6, %p265_p9 }
  0x23   : > { %p261_p11 = pneg %p260_p8 }
  0x25   : > { %p268_p10 = pnand %p267_p5, %p261_p11 }
  0x27   : > { %271 = shalt.err (!%p268_p10)
}
  0x28   : > { %203 = dma.hbm_to_vmem [thread:$0]  (!%p409_p12), %s482_s0, 128, %s81_s20, [#allocation3]  }
  0x29   : > { %p491_p13 = scmp.ne.s32.totalorder %s489_s18, 0 }
  0x2a   : > { %p492_p1 = scmp.eq.s32.totalorder (!%p491_p13), %s373_s10, 0 }
  0x2b   : > { %93 = sbr.rel (%p491_p13) target bundleno = 77 (0x4d), region = 24 }
  0x32   : > { %317 = dma.done.wait (%p492_p1), [#allocation3], 128   ;;  %p493_p0 = pmov %p492_p1 }
  0x33   : > { %s105_s3 = sand.u32 1, %s330_s7   ;;  %s191_s13 = sshll.u32 %s373_s10, 7  ;;  %v108_v0 = vld [vmem:[#allocation2] sm:$0xff] }
  0x34   : > { %319 = vsyncadd (%p493_p0), [#allocation3], 4294967168  ;;  %s189_s4 = sshll.u32 %s105_s3, 3  ;;  %v109_v1 = vmul.f32 2.0, %v108_v0  ;;  %s442_s19 = scalar_lea.hbm %s483_s1, %s191_s13 }
  0x35   : > { %s107_s5 = scalar_lea.vmem [#allocation5], %s189_s4  ;;  %s112_s20 = scalar_lea.sflag [#allocation4], %s105_s3 }
  0x36   : > { %s125_s11 = sshll.u32 %s107_s5, 4  ;;  %110 = vst [vmem:[%s107_s5] sm:$0xff] %v109_v1  ;;  %p494_p6 = scmp.ne.s32.totalorder %s487_s16, 0  ;;  %s437_s11 = int_to_ptr.vmem [resolvable:$true] %s125_s11 }
  0x37   : > { %s272_s21 = scalar_lea.vmem %s437_s11, 128  ;;  %s341_s10 = smov [#allocation5]  }
  0x38   : > { %p273_p5 = scmp.ne.s32.totalorder %s437_s11, %s272_s21  ;;  %s276_s22 = sshll.u32 %s341_s10, 4  ;;  %s277_s22 = int_to_ptr.vmem [resolvable:$false] %s276_s22 }
  0x39   : > { %s278_s23 = scalar_lea.vmem %s277_s22, 256  ;;  %p279_p12 = scmp.lt.s32.totalorder %s437_s11, %s277_s22 }
  0x3a   : > { %p274_p9 = pnand %p273_p5, %p494_p6  ;;  %p280_p2 = scmp.lt.s32.totalorder %s278_s23, %s272_s21 }
  0x3c   : > { %p275_p10 = pneg %p274_p9  ;;  %p281_p3 = por %p280_p2, %p279_p12 }
  0x3e   : > { %p282_p4 = pnand %p281_p3, %p275_p10 }
  0x40   : > { %285 = shalt.err (!%p282_p4)
}
  0x41   : > { %s286_s24 = scalar_lea.hbm %s442_s19, 128  ;;  %s290_s27 = scalar_lea.hbm %s483_s1, 256 }
  0x42   : > { %p287_p7 = scmp.ne.s32.totalorder %s442_s19, %s286_s24  ;;  %p291_p13 = scmp.lt.u32.totalorder %s442_s19, %s483_s1 }
  0x43   : > { %p292_p1 = scmp.lt.u32.totalorder %s290_s27, %s286_s24  ;;  %p294_p5 = scmp.lt.u32.totalorder %s286_s24, %s442_s19 }
  0x44   : > { %p288_p8 = pnand %p287_p7, %p494_p6 }
  0x45   : > { %p293_p0 = por %p292_p1, %p291_p13 }
  0x46   : > { %p289_p11 = pneg %p288_p8 }
  0x47   : > { %p295_p9 = por %p294_p5, %p293_p0 }
  0x49   : > { %p296_p10 = pnand %p295_p9, %p289_p11 }
  0x4b   : > { %299 = shalt.err (!%p296_p10)
}
  0x4c   : > { %198 = dma.vmem_to_hbm [thread:$0]  (%p494_p6), %s437_s11, 128, %s442_s19, %s112_s20  }
  0x4d PF: > { %p210_p12 = scmp.ge.s32.totalorder %s338_s9, 2  ;;  %s137_s30 = sand.u32 1, %s326_s6  }
  0x4e   : > { %p495_p2 = scmp.ne.s32.totalorder %s488_s17, 0  ;;  %s138_s2 = scalar_lea.sflag [#allocation4], %s137_s30 }
  0x50   : > { %p205_p3 = pnand %p210_p12, %p495_p2 }
  0x52   : > { %321 = dma.done.wait (!%p205_p3), %s138_s2, 128  }
  0x53   : > { %323 = vsyncadd (!%p205_p3), %s138_s2, 4294967168  ;;  %p12_p4 = scmp.ge.s32.totalorder %s377_s12, 4   ;;  %s496_s6 = smov %s330_s7 }
  0x54   : > { %s497_s7 = smov %s334_s8  ;;  %s498_s8 = smov %s388_s15 }
  0x55   : > { %s499_s9 = smov %s377_s12  ;;  %14 = sbr.rel (!%p12_p4) target bundleno = 4 (0x4), region = 61 }
  0x5c   :  { %143 = vsyncpa [#allocation3], 1 }
  0x5d   :  { %145 = vsyncpa [#allocation3 + $0x1], 1 }
  0x5e   :  { %146 = vsyncpa [#allocation4], 1 }
  0x5f   :  { %148 = vsyncpa [#allocation4 + $0x1], 1 }

// kernel: tpu_custom_call.1
= control target key start
LH: loop header
LB: loop body
LE: loop exit
PB: predicated region body
PF: predicated region fallthrough
CT: control target
= control target key end

     0   :  { %10 = vsyncpa [#allocation3], 0  ;;  %s2877_s0 = inlined_call_operand.vmem [shape: f32[128,32], index: 0, kind: input, shape index: {}]   ;;  %s2878_s1 = inlined_call_operand.vmem [shape: bf16[32,1024], index: 1, kind: input, shape index: {}]   ;;  %s2879_s2 = inlined_call_operand.vmem [shape: f32[1,1024], index: 2, kind: input, shape index: {}]   ;;  %s2880_s3 = inlined_call_operand.hbm [shape: bf16[1024,128], index: 3, kind: input, shape index: {}]   ;;  %s2881_s4 = inlined_call_operand.vmem [shape: f32[1,128], index: 4, kind: input, shape index: {}]   ;;  %s2882_s5 = inlined_call_operand.hbm [shape: f32[128,128], index: 5, kind: output, shape index: {}]  }
   0x1   :  { %11 = vsyncpa [#allocation4], 0  ;;  %s2313_s18 = smov [#allocation2]   ;;  %s2265_s22 = scalar_lea.hbm %s2880_s3, 8192 }
   0x2   :  { %s23_s19 = sshll.u32 %s2313_s18, 4  ;;  %p2266_p0 = scmp.ne.s32.totalorder %s2880_s3, %s2265_s22  ;;  %s24_s19 = int_to_ptr.vmem [resolvable:$true] %s23_s19 }
   0x3   :  { %p2269_p1 = scmp.lt.u32.totalorder %s2265_s22, %s2880_s3 }
   0x5   :  { %p2271_p2 = pnand %p2269_p1, %p2266_p0 }
   0x7   :  { %2274 = shalt.err (!%p2271_p2)
}
   0x8   :  { %s2275_s27 = scalar_lea.vmem %s24_s19, 8192  ;;  %p2280_p4 = scmp.lt.s32.totalorder %s24_s19, %s24_s19 }
   0x9   :  { %p2276_p3 = scmp.ne.s32.totalorder %s24_s19, %s2275_s27  ;;  %p2281_p5 = scmp.lt.s32.totalorder %s2275_s27, %s2275_s27 }
   0xb   :  { %p2282_p6 = por %p2281_p5, %p2280_p4 }
   0xd   :  { %p2283_p7 = pnand %p2282_p6, %p2276_p3 }
   0xf   :  { %2286 = shalt.err (!%p2283_p7)
}
  0x10   :  { %s2314_s28 = smov 64   ;;  %s2315_s29 = smov 4  }
  0x11   :  { %29 = dma.hbm_to_vmem [thread:$0]  %s2880_s3, 8192, %s24_s19, [#allocation3], %s2314_s28, %s2314_s28, %s2315_s29  }
  0x12   :  { %2309 = dma.done.wait [#allocation3], 8192  }
  0x13   :  { %2310 = vsyncadd [#allocation3], 4294959104  ;;  %v2316_v0 = vmov 0   ;;  %v60_v1 = vld [vmem:[%s2878_s1] sm:$0xff]  ;;  %v61_v3 = vld [vmem:[%s2878_s1 + $0x8] sm:$0xff]  ;;  %vm130_vm0 = vcmask 261120  }
  0x14   :  { %187 = vmatprep.mubr.bf16.mxu0 %v2316_v0  ;;  %300 = vmatprep.mubr.bf16.mxu1 %v2316_v0  ;;  %v62_v2 = vld [vmem:[%s2878_s1 + $0x20] sm:$0xff]  ;;  %v63_v5 = vld [vmem:[%s2878_s1 + $0x28] sm:$0xff]  ;;  %v541_v16 = vld [vmem:[%s2878_s1 + $0x10] sm:$0xff] }
  0x15   :  { %v1826_v4 = vcombine.high %v60_v1, %v62_v2  ;;  %v1825_v6 = vcombine.low %v60_v1, %v62_v2  ;;  %v64_v7 = vld [vmem:[%s2878_s1 + $0x40] sm:$0xff]  ;;  %v1828_v9 = vcombine.high %v61_v3, %v63_v5  ;;  %v1827_v10 = vcombine.low %v61_v3, %v63_v5  ;;  %v65_v12 = vld [vmem:[%s2878_s1 + $0x48] sm:$0xff]  ;;  %v543_v17 = vld [vmem:[%s2878_s1 + $0x30] sm:$0xff] }
  0x16   :  { %v66_v8 = vld [vmem:[%s2878_s1 + $0x60] sm:$0xff]  ;;  %v67_v13 = vld [vmem:[%s2878_s1 + $0x68] sm:$0xff]  ;;  %v542_v20 = vld [vmem:[%s2878_s1 + $0x18] sm:$0xff]  ;;  %v1850_v23 = vcombine.high %v541_v16, %v543_v17  ;;  %v1849_v28 = vcombine.low %v541_v16, %v543_v17 }
  0x17   :  { %v1830_v11 = vcombine.high %v64_v7, %v66_v8  ;;  %155 = vmatprep.subr.bf16.mxu0 %v1826_v4  ;;  %v1832_v14 = vcombine.high %v65_v12, %v67_v13  ;;  %v36_v15 = vld [vmem:[%s2877_s0] sm:$0xff]  ;;  %268 = vmatprep.subr.bf16.mxu1 %v1828_v9  ;;  %v1829_v18 = vcombine.low %v64_v7, %v66_v8  ;;  %v37_v19 = vld [vmem:[%s2877_s0 + $0x8] sm:$0xff]  ;;  %v544_v21 = vld [vmem:[%s2878_s1 + $0x38] sm:$0xff] }
  0x18   :  { %156 = vmatpush1.bf16.msra.mxu0 %v1825_v6  ;;  %269 = vmatpush1.bf16.msra.mxu1 %v1827_v10  ;;  %v1831_v22 = vcombine.low %v65_v12, %v67_v13  ;;  %v1852_v24 = vcombine.high %v542_v20, %v544_v21  ;;  %v2406_v25 = vpack.c.bf16 %v37_v19, %v36_v15  ;;  %v545_v26 = vld [vmem:[%s2878_s1 + $0x50] sm:$0xff]  ;;  %v546_v29 = vld [vmem:[%s2878_s1 + $0x58] sm:$0xff]  ;;  %v40_v39 = vld [vmem:[%s2877_s0 + $0x20] sm:$0xff] }
  0x19   :  { %157 = vmatprep.subr.bf16.mxu0 %v1830_v11  ;;  %270 = vmatprep.subr.bf16.mxu1 %v1832_v14  ;;  %v547_v27 = vld [vmem:[%s2878_s1 + $0x70] sm:$0xff]  ;;  %v548_v30 = vld [vmem:[%s2878_s1 + $0x78] sm:$0xff]  ;;  %v1851_v31 = vcombine.low %v542_v20, %v544_v21  ;;  %v41_v40 = vld [vmem:[%s2877_s0 + $0x28] sm:$0xff] }
  0x1a   :  { %v38_v32 = vld [vmem:[%s2877_s0 + $0x10] sm:$0xff]  ;;  %v39_v33 = vld [vmem:[%s2877_s0 + $0x18] sm:$0xff]  ;;  %v1854_v34 = vcombine.high %v545_v26, %v547_v27  ;;  %v1856_v35 = vcombine.high %v546_v29, %v548_v30  ;;  %v1853_v36 = vcombine.low %v545_v26, %v547_v27  ;;  %v1855_v37 = vcombine.low %v546_v29, %v548_v30  ;;  %v44_v45 = vld [vmem:[%s2877_s0 + $0x40] sm:$0xff] }
  0x1b   :  { %v53_v38 = vpack.c.bf16 %v39_v33, %v38_v32  ;;  %v54_v41 = vpack.c.bf16 %v41_v40, %v40_v39  ;;  %v42_v42 = vld [vmem:[%s2877_s0 + $0x30] sm:$0xff]  ;;  %v43_v43 = vld [vmem:[%s2877_s0 + $0x38] sm:$0xff]  ;;  %v45_v46 = vld [vmem:[%s2877_s0 + $0x48] sm:$0xff]  ;;  %v70_v27 = vlaneseq }
  0x1c   :  { %158 = vmatpush1.bf16.msra.mxu0 %v1829_v18  ;;  %271 = vmatpush1.bf16.msra.mxu1 %v1831_v22  ;;  %v55_v44 = vpack.c.bf16 %v43_v43, %v42_v42  ;;  %v56_v47 = vpack.c.bf16 %v45_v46, %v44_v45  ;;  %v46_v48 = vld [vmem:[%s2877_s0 + $0x50] sm:$0xff]  ;;  %v47_v49 = vld [vmem:[%s2877_s0 + $0x58] sm:$0xff]  ;;  %v48_v51 = vld [vmem:[%s2877_s0 + $0x60] sm:$0xff] }
  0x1d   :  { %611 = vmatprep.subr.bf16.mxu0 %v1850_v23  ;;  %724 = vmatprep.subr.bf16.mxu1 %v1852_v24  ;;  %v57_v50 = vpack.c.bf16 %v47_v49, %v46_v48  ;;  %v49_v52 = vld [vmem:[%s2877_s0 + $0x68] sm:$0xff]  ;;  %v50_v54 = vld [vmem:[%s2877_s0 + $0x70] sm:$0xff]  ;;  %v51_v55 = vld [vmem:[%s2877_s0 + $0x78] sm:$0xff] }
  0x1e   :  { %v58_v53 = vpack.c.bf16 %v49_v52, %v48_v51  ;;  %v59_v56 = vpack.c.bf16 %v51_v55, %v50_v54  ;;  %v2201_v57 = vld [vmem:[#allocation2 + $0x140] sm:$0xff]   ;;  %v2205_v61 = vld [vmem:[#allocation2 + $0x148] sm:$0xff]   ;;  %v2209_v2 = vld [vmem:[#allocation2 + $0x150] sm:$0xff]  }
  0x1f   :  { %1833 = vmatmul.mubr.msk.bf16.vlgmr.msra.gmra.mrb[0].mxu0 %vm130_vm0, %v2406_v25  ;;  %1841 = vmatmul.mubr.msk.bf16.vlgmr.msra.gmra.mrb[0].mxu1 %vm130_vm0, %v2406_v25  ;;  %v2202_v58 = vld [vmem:[#allocation2 + $0x100] sm:$0xff]   ;;  %v2206_v62 = vld [vmem:[#allocation2 + $0x108] sm:$0xff]   ;;  %v2210_v3 = vld [vmem:[#allocation2 + $0x110] sm:$0xff]  }
  0x20   :  { %612 = vmatpush1.bf16.msra.mxu0 %v1849_v28  ;;  %725 = vmatpush1.bf16.msra.mxu1 %v1851_v31  ;;  %v2203_v59 = vld [vmem:[#allocation2 + $0x1c0] sm:$0xff]   ;;  %v2207_v63 = vld [vmem:[#allocation2 + $0x1c8] sm:$0xff]   ;;  %v2211_v4 = vld [vmem:[#allocation2 + $0x1d0] sm:$0xff]   ;;  %v2528_v28 = vshrl.u32 %v70_v27, 7 }
  0x21   :  { %197 = vmatprep.mubr.bf16.mxu0 %v2316_v0  ;;  %310 = vmatprep.mubr.bf16.mxu1 %v2316_v0  ;;  %v2204_v60 = vld [vmem:[#allocation2 + $0x180] sm:$0xff]   ;;  %v2208_v1 = vld [vmem:[#allocation2 + $0x188] sm:$0xff]   ;;  %v2212_v5 = vld [vmem:[#allocation2 + $0x190] sm:$0xff]  }
  0x22   :  { %613 = vmatprep.subr.bf16.mxu0 %v1854_v34  ;;  %726 = vmatprep.subr.bf16.mxu1 %v1856_v35  ;;  %v2213_v6 = vld [vmem:[#allocation2 + $0x158] sm:$0xff]   ;;  %v2218_v10 = vld [vmem:[#allocation2 + $0x120] sm:$0xff]   ;;  %v2221_v13 = vld [vmem:[#allocation2 + $0x168] sm:$0xff]   ;;  %v72_v29 = vsub.s32 0, %v2528_v28  ;;  %v80_v31 = vsub.s32 2, %v2528_v28  ;;  %v76_v32 = vsub.s32 1, %v2528_v28 }
  0x23   :  { %v2214_v7 = vld [vmem:[#allocation2 + $0x118] sm:$0xff]   ;;  %v2219_v11 = vld [vmem:[#allocation2 + $0x1e0] sm:$0xff]   ;;  %v2222_v14 = vld [vmem:[#allocation2 + $0x128] sm:$0xff]   ;;  %v84_v33 = vsub.s32 3, %v2528_v28 }
  0x24   :  { %614 = vmatpush1.bf16.msra.mxu0 %v1853_v36  ;;  %727 = vmatpush1.bf16.msra.mxu1 %v1855_v37  ;;  %v2215_v8 = vld [vmem:[#allocation2 + $0x1d8] sm:$0xff]   ;;  %v2220_v12 = vld [vmem:[#allocation2 + $0x1a0] sm:$0xff]   ;;  %v2223_v15 = vld [vmem:[#allocation2 + $0x1e8] sm:$0xff]  }
  0x25   :  { %1938 = vmatprep.subr.bf16.mxu0 %v2201_v57  ;;  %2002 = vmatprep.subr.bf16.mxu1 %v2203_v59  ;;  %v2216_v9 = vld [vmem:[#allocation2 + $0x198] sm:$0xff]   ;;  %v2224_v16 = vld [vmem:[#allocation2 + $0x1a8] sm:$0xff]   ;;  %v2225_v17 = vld [vmem:[#allocation2 + $0x170] sm:$0xff]  }
  0x26   :  { %v2226_v18 = vld [vmem:[#allocation2 + $0x130] sm:$0xff]   ;;  %v2229_v21 = vld [vmem:[#allocation2 + $0x178] sm:$0xff]   ;;  %v2235_v26 = vld [vmem:[#allocation2 + $0xc0] sm:$0xff]  }
  0x27   :  { %1834 = vmatmul.mubr.msk.bf16.gmra.mrb[4].mxu0 %vm130_vm0, %v53_v38  ;;  %1842 = vmatmul.mubr.msk.bf16.gmra.mrb[4].mxu1 %vm130_vm0, %v53_v38  ;;  %v2227_v19 = vld [vmem:[#allocation2 + $0x1f0] sm:$0xff]   ;;  %v2231_v22 = vld [vmem:[#allocation2 + $0x1f8] sm:$0xff]   ;;  %v68_v30 = vld [vmem:[%s2879_s2] sm:$0xf] }
  0x28   :  { %207 = vmatprep.mubr.bf16.mxu0 %v2316_v0  ;;  %320 = vmatprep.mubr.bf16.mxu1 %v2316_v0  ;;  %v2228_v20 = vld [vmem:[#allocation2 + $0x1b0] sm:$0xff]   ;;  %v2230_v23 = vld [vmem:[#allocation2 + $0x138] sm:$0xff]   ;;  %v2539_v34 = vrot.slane %v68_v30, %v72_v29  ;;  %v2543_v35 = vrot.slane %v68_v30, %v80_v31  ;;  %v2547_v36 = vrot.slane %v68_v30, %v76_v32 }
  0x29   :  { %v2232_v24 = vld [vmem:[#allocation2 + $0x1b8] sm:$0xff]   ;;  %v2551_v37 = vrot.slane %v68_v30, %v84_v33 }
  0x2f   :  { %1835 = vmatmul.mubr.msk.bf16.gmra.mrb[8].mxu0 %vm130_vm0, %v54_v41  ;;  %1843 = vmatmul.mubr.msk.bf16.gmra.mrb[8].mxu1 %vm130_vm0, %v54_v41 }
  0x30   :  { %217 = vmatprep.mubr.bf16.mxu0 %v2316_v0  ;;  %330 = vmatprep.mubr.bf16.mxu1 %v2316_v0 }
  0x37   :  { %1836 = vmatmul.mubr.msk.bf16.gmra.mrb[12].mxu0 %vm130_vm0, %v55_v44  ;;  %1844 = vmatmul.mubr.msk.bf16.gmra.mrb[12].mxu1 %vm130_vm0, %v55_v44 }
  0x38   :  { %227 = vmatprep.mubr.bf16.mxu0 %v2316_v0  ;;  %340 = vmatprep.mubr.bf16.mxu1 %v2316_v0 }
  0x3f   :  { %1837 = vmatmul.mubr.msk.bf16.gmra.mrb[16].mxu0 %vm130_vm0, %v56_v47  ;;  %1845 = vmatmul.mubr.msk.bf16.gmra.mrb[16].mxu1 %vm130_vm0, %v56_v47 }
  0x40   :  { %237 = vmatprep.mubr.bf16.mxu0 %v2316_v0  ;;  %350 = vmatprep.mubr.bf16.mxu1 %v2316_v0 }
  0x47   :  { %1838 = vmatmul.mubr.msk.bf16.gmra.mrb[20].mxu0 %vm130_vm0, %v57_v50  ;;  %1846 = vmatmul.mubr.msk.bf16.gmra.mrb[20].mxu1 %vm130_vm0, %v57_v50 }
  0x48   :  { %247 = vmatprep.mubr.bf16.mxu0 %v2316_v0  ;;  %360 = vmatprep.mubr.bf16.mxu1 %v2316_v0 }
  0x4f   :  { %1839 = vmatmul.mubr.msk.bf16.gmra.mrb[24].mxu0 %vm130_vm0, %v58_v53  ;;  %1847 = vmatmul.mubr.msk.bf16.gmra.mrb[24].mxu1 %vm130_vm0, %v58_v53 }
  0x50   :  { %257 = vmatprep.mubr.bf16.mxu0 %v2316_v0  ;;  %370 = vmatprep.mubr.bf16.mxu1 %v2316_v0 }
  0x57   :  { %1840 = vmatmul.mubr.msk.bf16.gmra.mrb[28].mxu0 %vm130_vm0, %v59_v56  ;;  %1848 = vmatmul.mubr.msk.bf16.gmra.mrb[28].mxu1 %vm130_vm0, %v59_v56 }
  0x58   :  { %643 = vmatprep.mubr.bf16.mxu0 %v2316_v0  ;;  %756 = vmatprep.mubr.bf16.mxu1 %v2316_v0 }
  0x5f   :  { %1857 = vmatmul.mubr.msk.bf16.vlgmr.msra.gmra.mrb[32].mxu0 %vm130_vm0, %v2406_v25  ;;  %1865 = vmatmul.mubr.msk.bf16.vlgmr.msra.gmra.mrb[32].mxu1 %vm130_vm0, %v2406_v25  ;;  %v2233_v25 = vld [vmem:[#allocation2 + $0x40] sm:$0xff]  }
  0x60   :  { %653 = vmatprep.mubr.bf16.mxu0 %v2316_v0  ;;  %766 = vmatprep.mubr.bf16.mxu1 %v2316_v0 }
  0x61   :  { %1939 = vmatpush3.bf16.msra.mxu0 %v2202_v58  ;;  %2003 = vmatpush3.bf16.msra.mxu1 %v2204_v60 }
  0x62   :  { %1940 = vmatprep.subr.bf16.mxu0 %v2205_v61  ;;  %2004 = vmatprep.subr.bf16.mxu1 %v2207_v63 }
  0x65   :  { %1941 = vmatpush3.bf16.msra.mxu0 %v2206_v62  ;;  %2005 = vmatpush3.bf16.msra.mxu1 %v2208_v1 }
  0x66   :  { %1942 = vmatprep.subr.bf16.mxu0 %v2209_v2  ;;  %2006 = vmatprep.subr.bf16.mxu1 %v2211_v4 }
  0x67   :  { %1858 = vmatmul.mubr.msk.bf16.gmra.mrb[36].mxu0 %vm130_vm0, %v53_v38  ;;  %1866 = vmatmul.mubr.msk.bf16.gmra.mrb[36].mxu1 %vm130_vm0, %v53_v38 }
  0x68   :  { %663 = vmatprep.mubr.bf16.mxu0 %v2316_v0  ;;  %776 = vmatprep.mubr.bf16.mxu1 %v2316_v0 }
  0x69   :  { %1943 = vmatpush3.bf16.msra.mxu0 %v2210_v3  ;;  %2007 = vmatpush3.bf16.msra.mxu1 %v2212_v5 }
  0x6a   :  { %1944 = vmatprep.subr.bf16.mxu0 %v2213_v6  ;;  %2008 = vmatprep.subr.bf16.mxu1 %v2215_v8 }
  0x6d   :  { %1945 = vmatpush3.bf16.msra.mxu0 %v2214_v7  ;;  %2009 = vmatpush3.bf16.msra.mxu1 %v2216_v9 }
  0x6e   :  { %2010 = vmatprep.subr.bf16.mxu1 %v2219_v11 }
  0x6f   :  { %1859 = vmatmul.mubr.msk.bf16.gmra.mrb[40].mxu0 %vm130_vm0, %v54_v41  ;;  %1867 = vmatmul.mubr.msk.bf16.gmra.mrb[40].mxu1 %vm130_vm0, %v54_v41 }
  0x70   :  { %673 = vmatprep.mubr.bf16.mxu0 %v2316_v0  ;;  %786 = vmatprep.mubr.bf16.mxu1 %v2316_v0 }
  0x71   :  { %2011 = vmatpush3.bf16.msra.mxu1 %v2220_v12 }
  0x72   :  { %2012 = vmatprep.subr.bf16.mxu1 %v2223_v15 }
  0x75   :  { %2013 = vmatpush3.bf16.msra.mxu1 %v2224_v16 }
  0x76   :  { %2014 = vmatprep.subr.bf16.mxu1 %v2227_v19 }
  0x77   :  { %1860 = vmatmul.mubr.msk.bf16.gmra.mrb[44].mxu0 %vm130_vm0, %v55_v44  ;;  %1868 = vmatmul.mubr.msk.bf16.gmra.mrb[44].mxu1 %vm130_vm0, %v55_v44 }
  0x78   :  { %683 = vmatprep.mubr.bf16.mxu0 %v2316_v0  ;;  %796 = vmatprep.mubr.bf16.mxu1 %v2316_v0 }
  0x79   :  { %2015 = vmatpush3.bf16.msra.mxu1 %v2228_v20 }
  0x7a   :  { %2016 = vmatprep.subr.bf16.mxu1 %v2231_v22 }
  0x7d   :  { %2017 = vmatpush3.bf16.msra.mxu1 %v2232_v24 }
  0x7e   :  { %2130 = vmatprep.subr.bf16.mxu1 %v2235_v26 }
  0x7f   :  { %1861 = vmatmul.mubr.msk.bf16.gmra.mrb[48].mxu0 %vm130_vm0, %v56_v47  ;;  %1869 = vmatmul.mubr.msk.bf16.gmra.mrb[48].mxu1 %vm130_vm0, %v56_v47 }
  0x80   :  { %693 = vmatprep.mubr.bf16.mxu0 %v2316_v0  ;;  %806 = vmatprep.mubr.bf16.mxu1 %v2316_v0 }
  0x87   :  { %1862 = vmatmul.mubr.msk.bf16.gmra.mrb[52].mxu0 %vm130_vm0, %v57_v50  ;;  %1870 = vmatmul.mubr.msk.bf16.gmra.mrb[52].mxu1 %vm130_vm0, %v57_v50 }
  0x88   :  { %703 = vmatprep.mubr.bf16.mxu0 %v2316_v0  ;;  %816 = vmatprep.mubr.bf16.mxu1 %v2316_v0 }
  0x8f   :  { %1863 = vmatmul.mubr.msk.bf16.gmra.mrb[56].mxu0 %vm130_vm0, %v58_v53  ;;  %1871 = vmatmul.mubr.msk.bf16.gmra.mrb[56].mxu1 %vm130_vm0, %v58_v53 }
  0x90   :  { %713 = vmatprep.mubr.bf16.mxu0 %v2316_v0  ;;  %826 = vmatprep.mubr.bf16.mxu1 %v2316_v0  ;;  %v2217_v0 = vld [vmem:[#allocation2 + $0x160] sm:$0xff]  }
  0x91   :  { %1946 = vmatprep.subr.bf16.mxu0 %v2217_v0 }
  0x92   :  { %1947 = vmatpush3.bf16.msra.mxu0 %v2218_v10 }
  0x93   :  { %1948 = vmatprep.subr.bf16.mxu0 %v2221_v13 }
  0x96   :  { %1949 = vmatpush3.bf16.msra.mxu0 %v2222_v14 }
  0x97   :  { %1864 = vmatmul.mubr.msk.bf16.gmra.mrb[60].mxu0 %vm130_vm0, %v59_v56  ;;  %1872 = vmatmul.mubr.msk.bf16.gmra.mrb[60].mxu1 %vm130_vm0, %v59_v56 }
  0x98   :  { %1950 = vmatprep.subr.bf16.mxu0 %v2225_v17 }
  0x9a   :  { %1951 = vmatpush3.bf16.msra.mxu0 %v2226_v18 }
  0x9b   :  { %1952 = vmatprep.subr.bf16.mxu0 %v2229_v21 }
  0x9e   :  { %1953 = vmatpush3.bf16.msra.mxu0 %v2230_v23 }
  0x9f   :  { %2066 = vmatprep.subr.bf16.mxu0 %v2233_v25 }
  0xf2   :  { %v189_v38 = vpop.f32.mrb[0].mxu0  ;;  %v302_v40 = vpop.f32.mrb[0].mxu1 }
  0xf3   :  { %v190_v39 = vadd.f32 %v189_v38, %v2539_v34  ;;  %v191_v41 = vpop.f32.mrb[1].mxu0  ;;  %v303_v42 = vadd.f32 %v302_v40, %v2543_v35  ;;  %v304_v44 = vpop.f32.mrb[1].mxu1 }
  0xf4   :  { %v192_v43 = vadd.f32 %v191_v41, %v2547_v36  ;;  %v193_v45 = vpop.f32.mrb[2].mxu0  ;;  %v305_v46 = vadd.f32 %v304_v44, %v2551_v37  ;;  %v306_v48 = vpop.f32.mrb[2].mxu1 }
  0xf5   :  { %v194_v47 = vadd.f32 %v193_v45, %v2539_v34  ;;  %v195_v49 = vpop.f32.mrb[3].mxu0  ;;  %v383_v50 = vmax.f32 %v303_v42, 0.0  ;;  %v307_v51 = vadd.f32 %v306_v48, %v2543_v35  ;;  %v308_v53 = vpop.f32.mrb[3].mxu1  ;;  %v381_v54 = vmax.f32 %v190_v39, 0.0 }
  0xf6   :  { %v196_v52 = vadd.f32 %v195_v49, %v2547_v36  ;;  %v384_v55 = vmax.f32 %v305_v46, 0.0  ;;  %v309_v57 = vadd.f32 %v308_v53, %v2551_v37  ;;  %v382_v58 = vmax.f32 %v192_v43, 0.0 }
  0xf7   :  { %v385_v56 = vmax.f32 %v194_v47, 0.0  ;;  %v387_v59 = vmax.f32 %v307_v51, 0.0 }
  0xf8   :  { %v386_v60 = vmax.f32 %v196_v52, 0.0  ;;  %v388_v62 = vmax.f32 %v309_v57, 0.0 }
  0xf9   :  { %v2561_v61 = vpack.c.bf16 %v385_v56, %v381_v54  ;;  %v2563_v63 = vpack.c.bf16 %v387_v59, %v383_v50 }
  0xfa   :  { %v2565_v1 = vpack.c.bf16 %v386_v60, %v382_v58  ;;  %v199_v2 = vpop.f32.mrb[4].mxu0  ;;  %v2567_v3 = vpack.c.bf16 %v388_v62, %v384_v55  ;;  %v312_v5 = vpop.f32.mrb[4].mxu1 }
  0xfb   :  { %v200_v4 = vadd.f32 %v199_v2, %v2539_v34  ;;  %v201_v6 = vpop.f32.mrb[5].mxu0  ;;  %v313_v7 = vadd.f32 %v312_v5, %v2543_v35  ;;  %v314_v9 = vpop.f32.mrb[5].mxu1 }
  0xfc   :  { %v202_v8 = vadd.f32 %v201_v6, %v2547_v36  ;;  %v203_v0 = vpop.f32.mrb[6].mxu0  ;;  %v315_v10 = vadd.f32 %v314_v9, %v2551_v37  ;;  %v316_v12 = vpop.f32.mrb[6].mxu1 }
  0xfd   :  { %v204_v11 = vadd.f32 %v203_v0, %v2539_v34  ;;  %v205_v13 = vpop.f32.mrb[7].mxu0  ;;  %v391_v14 = vmax.f32 %v313_v7, 0.0  ;;  %v317_v15 = vadd.f32 %v316_v12, %v2543_v35  ;;  %v318_v17 = vpop.f32.mrb[7].mxu1  ;;  %v389_v18 = vmax.f32 %v200_v4, 0.0 }
  0xfe   :  { %v206_v16 = vadd.f32 %v205_v13, %v2547_v36  ;;  %v392_v19 = vmax.f32 %v315_v10, 0.0  ;;  %v319_v21 = vadd.f32 %v318_v17, %v2551_v37  ;;  %v390_v22 = vmax.f32 %v202_v8, 0.0 }
  0xff   :  { %v393_v20 = vmax.f32 %v204_v11, 0.0  ;;  %v395_v23 = vmax.f32 %v317_v15, 0.0 }
 0x100   :  { %v394_v24 = vmax.f32 %v206_v16, 0.0  ;;  %v396_v26 = vmax.f32 %v319_v21, 0.0 }
 0x101   :  { %v2577_v25 = vpack.c.bf16 %v393_v20, %v389_v18  ;;  %v2579_v27 = vpack.c.bf16 %v395_v23, %v391_v14 }
 0x102   :  { %v2581_v30 = vpack.c.bf16 %v394_v24, %v390_v22  ;;  %v209_v38 = vpop.f32.mrb[8].mxu0  ;;  %v2583_v39 = vpack.c.bf16 %v396_v26, %v392_v19  ;;  %v322_v41 = vpop.f32.mrb[8].mxu1 }
 0x103   :  { %v210_v40 = vadd.f32 %v209_v38, %v2539_v34  ;;  %v211_v42 = vpop.f32.mrb[9].mxu0  ;;  %v323_v43 = vadd.f32 %v322_v41, %v2543_v35  ;;  %v324_v45 = vpop.f32.mrb[9].mxu1 }
 0x104   :  { %v212_v44 = vadd.f32 %v211_v42, %v2547_v36  ;;  %v213_v46 = vpop.f32.mrb[10].mxu0  ;;  %v325_v47 = vadd.f32 %v324_v45, %v2551_v37  ;;  %v326_v49 = vpop.f32.mrb[10].mxu1 }
 0x105   :  { %v214_v48 = vadd.f32 %v213_v46, %v2539_v34  ;;  %v215_v50 = vpop.f32.mrb[11].mxu0  ;;  %v399_v51 = vmax.f32 %v323_v43, 0.0  ;;  %v327_v52 = vadd.f32 %v326_v49, %v2543_v35  ;;  %v328_v54 = vpop.f32.mrb[11].mxu1  ;;  %v397_v55 = vmax.f32 %v210_v40, 0.0 }
 0x106   :  { %v216_v53 = vadd.f32 %v215_v50, %v2547_v36  ;;  %v400_v56 = vmax.f32 %v325_v47, 0.0  ;;  %v329_v58 = vadd.f32 %v328_v54, %v2551_v37  ;;  %v398_v59 = vmax.f32 %v212_v44, 0.0 }
 0x107   :  { %v401_v57 = vmax.f32 %v214_v48, 0.0  ;;  %v403_v60 = vmax.f32 %v327_v52, 0.0 }
 0x108   :  { %v402_v62 = vmax.f32 %v216_v53, 0.0  ;;  %v404_v4 = vmax.f32 %v329_v58, 0.0 }
 0x109   :  { %v2593_v2 = vpack.c.bf16 %v401_v57, %v397_v55  ;;  %v2595_v5 = vpack.c.bf16 %v403_v60, %v399_v51 }
 0x10a   :  { %v2597_v6 = vpack.c.bf16 %v402_v62, %v398_v59  ;;  %v219_v7 = vpop.f32.mrb[12].mxu0  ;;  %v2599_v8 = vpack.c.bf16 %v404_v4, %v400_v56  ;;  %v332_v0 = vpop.f32.mrb[12].mxu1 }
 0x10b   :  { %v220_v9 = vadd.f32 %v219_v7, %v2539_v34  ;;  %v221_v10 = vpop.f32.mrb[13].mxu0  ;;  %v333_v11 = vadd.f32 %v332_v0, %v2543_v35  ;;  %v334_v13 = vpop.f32.mrb[13].mxu1 }
 0x10c   :  { %v222_v12 = vadd.f32 %v221_v10, %v2547_v36  ;;  %v223_v14 = vpop.f32.mrb[14].mxu0  ;;  %v335_v15 = vadd.f32 %v334_v13, %v2551_v37  ;;  %v336_v17 = vpop.f32.mrb[14].mxu1 }
 0x10d   :  { %v224_v16 = vadd.f32 %v223_v14, %v2539_v34  ;;  %v225_v18 = vpop.f32.mrb[15].mxu0  ;;  %v407_v19 = vmax.f32 %v333_v11, 0.0  ;;  %v337_v20 = vadd.f32 %v336_v17, %v2543_v35  ;;  %v338_v22 = vpop.f32.mrb[15].mxu1  ;;  %v405_v23 = vmax.f32 %v220_v9, 0.0 }
 0x10e   :  { %v226_v21 = vadd.f32 %v225_v18, %v2547_v36  ;;  %v408_v24 = vmax.f32 %v335_v15, 0.0  ;;  %v339_v38 = vadd.f32 %v338_v22, %v2551_v37  ;;  %v406_v40 = vmax.f32 %v222_v12, 0.0 }
 0x10f   :  { %v409_v26 = vmax.f32 %v224_v16, 0.0  ;;  %v411_v41 = vmax.f32 %v337_v20, 0.0 }
 0x110   :  { %v410_v42 = vmax.f32 %v226_v21, 0.0  ;;  %v412_v44 = vmax.f32 %v339_v38, 0.0 }
 0x111   :  { %v2609_v43 = vpack.c.bf16 %v409_v26, %v405_v23  ;;  %v2611_v45 = vpack.c.bf16 %v411_v41, %v407_v19 }
 0x112   :  { %v2613_v46 = vpack.c.bf16 %v410_v42, %v406_v40  ;;  %v229_v47 = vpop.f32.mrb[16].mxu0  ;;  %v2615_v48 = vpack.c.bf16 %v412_v44, %v408_v24  ;;  %v342_v50 = vpop.f32.mrb[16].mxu1 }
 0x113   :  { %v230_v49 = vadd.f32 %v229_v47, %v2539_v34  ;;  %v231_v51 = vpop.f32.mrb[17].mxu0  ;;  %v343_v52 = vadd.f32 %v342_v50, %v2543_v35  ;;  %v344_v54 = vpop.f32.mrb[17].mxu1 }
 0x114   :  { %v232_v53 = vadd.f32 %v231_v51, %v2547_v36  ;;  %v233_v55 = vpop.f32.mrb[18].mxu0  ;;  %v345_v56 = vadd.f32 %v344_v54, %v2551_v37  ;;  %v346_v58 = vpop.f32.mrb[18].mxu1 }
 0x115   :  { %v234_v57 = vadd.f32 %v233_v55, %v2539_v34  ;;  %v235_v59 = vpop.f32.mrb[19].mxu0  ;;  %v415_v60 = vmax.f32 %v343_v52, 0.0  ;;  %v347_v62 = vadd.f32 %v346_v58, %v2543_v35  ;;  %v348_v7 = vpop.f32.mrb[19].mxu1  ;;  %v413_v9 = vmax.f32 %v230_v49, 0.0 }
 0x116   :  { %v236_v4 = vadd.f32 %v235_v59, %v2547_v36  ;;  %v416_v0 = vmax.f32 %v345_v56, 0.0  ;;  %v349_v11 = vadd.f32 %v348_v7, %v2551_v37  ;;  %v414_v12 = vmax.f32 %v232_v53, 0.0 }
 0x117   :  { %v417_v10 = vmax.f32 %v234_v57, 0.0  ;;  %v419_v13 = vmax.f32 %v347_v62, 0.0 }
 0x118   :  { %v418_v14 = vmax.f32 %v236_v4, 0.0  ;;  %v420_v16 = vmax.f32 %v349_v11, 0.0 }
 0x119   :  { %v2625_v15 = vpack.c.bf16 %v417_v10, %v413_v9  ;;  %v2627_v17 = vpack.c.bf16 %v419_v13, %v415_v60 }
 0x11a   :  { %v2629_v18 = vpack.c.bf16 %v418_v14, %v414_v12  ;;  %v239_v19 = vpop.f32.mrb[20].mxu0  ;;  %v2631_v20 = vpack.c.bf16 %v420_v16, %v416_v0  ;;  %v352_v22 = vpop.f32.mrb[20].mxu1 }
 0x11b   :  { %v240_v21 = vadd.f32 %v239_v19, %v2539_v34  ;;  %v241_v23 = vpop.f32.mrb[21].mxu0  ;;  %v353_v24 = vadd.f32 %v352_v22, %v2543_v35  ;;  %v354_v38 = vpop.f32.mrb[21].mxu1 }
 0x11c   :  { %v242_v26 = vadd.f32 %v241_v23, %v2547_v36  ;;  %v243_v40 = vpop.f32.mrb[22].mxu0  ;;  %v355_v41 = vadd.f32 %v354_v38, %v2551_v37  ;;  %v356_v44 = vpop.f32.mrb[22].mxu1 }
 0x11d   :  { %v244_v42 = vadd.f32 %v243_v40, %v2539_v34  ;;  %v245_v47 = vpop.f32.mrb[23].mxu0  ;;  %v423_v49 = vmax.f32 %v353_v24, 0.0  ;;  %v357_v50 = vadd.f32 %v356_v44, %v2543_v35  ;;  %v358_v52 = vpop.f32.mrb[23].mxu1  ;;  %v421_v53 = vmax.f32 %v240_v21, 0.0 }
 0x11e   :  { %v246_v51 = vadd.f32 %v245_v47, %v2547_v36  ;;  %v424_v54 = vmax.f32 %v355_v41, 0.0  ;;  %v359_v56 = vadd.f32 %v358_v52, %v2551_v37  ;;  %v422_v57 = vmax.f32 %v242_v26, 0.0 }
 0x11f   :  { %v425_v55 = vmax.f32 %v244_v42, 0.0  ;;  %v427_v58 = vmax.f32 %v357_v50, 0.0 }
 0x120   :  { %v426_v59 = vmax.f32 %v246_v51, 0.0  ;;  %v428_v62 = vmax.f32 %v359_v56, 0.0 }
 0x121   :  { %v2641_v60 = vpack.c.bf16 %v425_v55, %v421_v53  ;;  %v2643_v4 = vpack.c.bf16 %v427_v58, %v423_v49  ;;  %v549_v58 = vld [vmem:[%s2879_s2 + $0x4] sm:$0xf] }
 0x122   :  { %v2645_v7 = vpack.c.bf16 %v426_v59, %v422_v57  ;;  %v249_v9 = vpop.f32.mrb[24].mxu0  ;;  %v2647_v0 = vpack.c.bf16 %v428_v62, %v424_v54  ;;  %v362_v11 = vpop.f32.mrb[24].mxu1 }
 0x123   :  { %v250_v10 = vadd.f32 %v249_v9, %v2539_v34  ;;  %v251_v12 = vpop.f32.mrb[25].mxu0  ;;  %v363_v13 = vadd.f32 %v362_v11, %v2543_v35  ;;  %v364_v16 = vpop.f32.mrb[25].mxu1 }
 0x124   :  { %v252_v14 = vadd.f32 %v251_v12, %v2547_v36  ;;  %v253_v19 = vpop.f32.mrb[26].mxu0  ;;  %v365_v21 = vadd.f32 %v364_v16, %v2551_v37  ;;  %v366_v23 = vpop.f32.mrb[26].mxu1 }
 0x125   :  { %v254_v22 = vadd.f32 %v253_v19, %v2539_v34  ;;  %v255_v24 = vpop.f32.mrb[27].mxu0  ;;  %v431_v26 = vmax.f32 %v363_v13, 0.0  ;;  %v367_v38 = vadd.f32 %v366_v23, %v2543_v35  ;;  %v368_v41 = vpop.f32.mrb[27].mxu1  ;;  %v429_v42 = vmax.f32 %v250_v10, 0.0 }
 0x126   :  { %v256_v40 = vadd.f32 %v255_v24, %v2547_v36  ;;  %v432_v44 = vmax.f32 %v365_v21, 0.0  ;;  %v369_v49 = vadd.f32 %v368_v41, %v2551_v37  ;;  %v430_v50 = vmax.f32 %v252_v14, 0.0 }
 0x127   :  { %v433_v47 = vmax.f32 %v254_v22, 0.0  ;;  %v435_v51 = vmax.f32 %v367_v38, 0.0  ;;  %v2675_v23 = vrot.slane %v549_v58, %v72_v29  ;;  %v2681_v41 = vrot.slane %v549_v58, %v76_v32 }
 0x128   :  { %v434_v52 = vmax.f32 %v256_v40, 0.0  ;;  %v436_v54 = vmax.f32 %v369_v49, 0.0  ;;  %v2686_v29 = vrot.slane %v549_v58, %v80_v31 }
 0x129   :  { %v2657_v53 = vpack.c.bf16 %v433_v47, %v429_v42  ;;  %v2659_v55 = vpack.c.bf16 %v435_v51, %v431_v26 }
 0x12a   :  { %v2661_v56 = vpack.c.bf16 %v434_v52, %v430_v50  ;;  %v259_v57 = vpop.f32.mrb[28].mxu0  ;;  %v2666_v59 = vpack.c.bf16 %v436_v54, %v432_v44  ;;  %v372_v9 = vpop.f32.mrb[28].mxu1  ;;  %v2692_v52 = vrot.slane %v549_v58, %v84_v33 }
 0x12b   :  { %v260_v62 = vadd.f32 %v259_v57, %v2539_v34  ;;  %v261_v10 = vpop.f32.mrb[29].mxu0  ;;  %v373_v11 = vadd.f32 %v372_v9, %v2543_v35  ;;  %v374_v13 = vpop.f32.mrb[29].mxu1 }
 0x12c   :  { %v262_v12 = vadd.f32 %v261_v10, %v2547_v36  ;;  %v263_v14 = vpop.f32.mrb[30].mxu0  ;;  %v375_v16 = vadd.f32 %v374_v13, %v2551_v37  ;;  %v376_v21 = vpop.f32.mrb[30].mxu1 }
 0x12d   :  { %v264_v19 = vadd.f32 %v263_v14, %v2539_v34  ;;  %v265_v22 = vpop.f32.mrb[31].mxu0  ;;  %v439_v24 = vmax.f32 %v373_v11, 0.0  ;;  %v377_v26 = vadd.f32 %v376_v21, %v2543_v35  ;;  %v378_v40 = vpop.f32.mrb[31].mxu1  ;;  %v437_v42 = vmax.f32 %v260_v62, 0.0 }
 0x12e   :  { %v266_v38 = vadd.f32 %v265_v22, %v2547_v36  ;;  %v440_v44 = vmax.f32 %v375_v16, 0.0  ;;  %v379_v34 = vadd.f32 %v378_v40, %v2551_v37  ;;  %v438_v49 = vmax.f32 %v262_v12, 0.0 }
 0x12f   :  { %v441_v47 = vmax.f32 %v264_v19, 0.0  ;;  %v443_v50 = vmax.f32 %v377_v26, 0.0 }
 0x130   :  { %v442_v51 = vmax.f32 %v266_v38, 0.0  ;;  %v444_v36 = vmax.f32 %v379_v34, 0.0 }
 0x131   :  { %v2688_v35 = vpack.c.bf16 %v441_v47, %v437_v42  ;;  %v2694_v32 = vpack.c.bf16 %v443_v50, %v439_v24 }
 0x132   :  { %v2696_v54 = vpack.c.bf16 %v442_v51, %v438_v49  ;;  %v645_v57 = vpop.f32.mrb[32].mxu0  ;;  %v2698_v37 = vpack.c.bf16 %v444_v36, %v440_v44  ;;  %v758_v9 = vpop.f32.mrb[32].mxu1 }
 0x133   :  { %v646_v62 = vadd.f32 %v645_v57, %v2675_v23  ;;  %v647_v10 = vpop.f32.mrb[33].mxu0  ;;  %v759_v31 = vadd.f32 %v758_v9, %v2686_v29  ;;  %v760_v12 = vpop.f32.mrb[33].mxu1  ;;  %v2234_v57 = vld [vmem:[#allocation2] sm:$0xff]  }
 0x134   :  { %v648_v11 = vadd.f32 %v647_v10, %v2681_v41  ;;  %v649_v13 = vpop.f32.mrb[34].mxu0  ;;  %v761_v28 = vadd.f32 %v760_v12, %v2692_v52  ;;  %v762_v58 = vpop.f32.mrb[34].mxu1 }
 0x135   :  { %v650_v33 = vadd.f32 %v649_v13, %v2675_v23  ;;  %v651_v14 = vpop.f32.mrb[35].mxu0  ;;  %v839_v16 = vmax.f32 %v759_v31, 0.0  ;;  %v763_v19 = vadd.f32 %v762_v58, %v2686_v29  ;;  %v764_v22 = vpop.f32.mrb[35].mxu1  ;;  %v837_v24 = vmax.f32 %v646_v62, 0.0  ;;  %v2236_v13 = vld [vmem:[#allocation2 + $0x80] sm:$0xff]   ;;  %v2237_v62 = vld [vmem:[#allocation2 + $0x48] sm:$0xff]  }
 0x136   :  { %v652_v21 = vadd.f32 %v651_v14, %v2681_v41  ;;  %v840_v26 = vmax.f32 %v761_v28, 0.0  ;;  %v765_v40 = vadd.f32 %v764_v22, %v2692_v52  ;;  %v838_v42 = vmax.f32 %v648_v11, 0.0  ;;  %v2239_v14 = vld [vmem:[#allocation2 + $0xc8] sm:$0xff]  }
 0x137   :  { %v841_v38 = vmax.f32 %v650_v33, 0.0  ;;  %v843_v44 = vmax.f32 %v763_v19, 0.0 }
 0x138   :  { %v842_v47 = vmax.f32 %v652_v21, 0.0  ;;  %v844_v49 = vmax.f32 %v765_v40, 0.0 }
 0x139   :  { %v901_v34 = vpack.c.bf16 %v841_v38, %v837_v24  ;;  %v903_v50 = vpack.c.bf16 %v843_v44, %v839_v16 }
 0x13a   :  { %v902_v51 = vpack.c.bf16 %v842_v47, %v838_v42  ;;  %v655_v36 = vpop.f32.mrb[36].mxu0  ;;  %v904_v9 = vpack.c.bf16 %v844_v49, %v840_v26  ;;  %v768_v31 = vpop.f32.mrb[36].mxu1  ;;  %v2238_v42 = vld [vmem:[#allocation2 + $0x8] sm:$0xff]  }
 0x13b   :  { %v656_v10 = vadd.f32 %v655_v36, %v2675_v23  ;;  %v657_v12 = vpop.f32.mrb[37].mxu0  ;;  %v769_v28 = vadd.f32 %v768_v31, %v2686_v29  ;;  %v770_v11 = vpop.f32.mrb[37].mxu1  ;;  %v2240_v36 = vld [vmem:[#allocation2 + $0x88] sm:$0xff]  }
 0x13c   :  { %v658_v33 = vadd.f32 %v657_v12, %v2681_v41  ;;  %v659_v58 = vpop.f32.mrb[38].mxu0  ;;  %1221 = vmatprep.mubr.bf16.mxu0 %v902_v51  ;;  %v771_v16 = vadd.f32 %v770_v11, %v2692_v52  ;;  %v772_v21 = vpop.f32.mrb[38].mxu1  ;;  %1318 = vmatprep.mubr.bf16.mxu1 %v904_v9  ;;  %v2241_v9 = vld [vmem:[#allocation2 + $0x50] sm:$0xff]  }
 0x13d   :  { %v660_v19 = vadd.f32 %v659_v58, %v2675_v23  ;;  %v661_v22 = vpop.f32.mrb[39].mxu0  ;;  %1222 = vmatmul.mubr.bf16.vlgmr.msra.gmra.mrb[64].mxu0 %v901_v34  ;;  %v847_v24 = vmax.f32 %v769_v28, 0.0  ;;  %v773_v26 = vadd.f32 %v772_v21, %v2686_v29  ;;  %v774_v40 = vpop.f32.mrb[39].mxu1  ;;  %1319 = vmatmul.mubr.bf16.vlgmr.msra.gmra.mrb[64].mxu1 %v903_v50  ;;  %v845_v44 = vmax.f32 %v656_v10, 0.0  ;;  %v2243_v28 = vld [vmem:[#allocation2 + $0xd0] sm:$0xff]  }
 0x13e   :  { %v662_v38 = vadd.f32 %v661_v22, %v2681_v41  ;;  %2067 = vmatpush3.bf16.msra.mxu0 %v2234_v57  ;;  %v848_v47 = vmax.f32 %v771_v16, 0.0  ;;  %v775_v51 = vadd.f32 %v774_v40, %v2692_v52  ;;  %2131 = vmatpush3.bf16.msra.mxu1 %v2236_v13  ;;  %v846_v31 = vmax.f32 %v658_v33, 0.0  ;;  %v2242_v10 = vld [vmem:[#allocation2 + $0x10] sm:$0xff]   ;;  %v2245_v33 = vld [vmem:[#allocation2 + $0x58] sm:$0xff]  }
 0x13f   :  { %v849_v49 = vmax.f32 %v660_v19, 0.0  ;;  %2068 = vmatprep.subr.bf16.mxu0 %v2237_v62  ;;  %v851_v34 = vmax.f32 %v773_v26, 0.0  ;;  %2132 = vmatprep.subr.bf16.mxu1 %v2239_v14  ;;  %v2244_v62 = vld [vmem:[#allocation2 + $0x90] sm:$0xff]  }
 0x140   :  { %v850_v12 = vmax.f32 %v662_v38, 0.0  ;;  %v852_v58 = vmax.f32 %v775_v51, 0.0 }
 0x141   :  { %v905_v11 = vpack.c.bf16 %v849_v49, %v845_v44  ;;  %v907_v21 = vpack.c.bf16 %v851_v34, %v847_v24  ;;  %v2247_v24 = vld [vmem:[#allocation2 + $0xd8] sm:$0xff]  }
 0x142   :  { %v906_v50 = vpack.c.bf16 %v850_v12, %v846_v31  ;;  %v665_v57 = vpop.f32.mrb[40].mxu0  ;;  %2069 = vmatpush3.bf16.msra.mxu0 %v2238_v42  ;;  %v908_v16 = vpack.c.bf16 %v852_v58, %v848_v47  ;;  %v778_v22 = vpop.f32.mrb[40].mxu1  ;;  %2133 = vmatpush3.bf16.msra.mxu1 %v2240_v36  ;;  %v2246_v34 = vld [vmem:[#allocation2 + $0x18] sm:$0xff]  }
 0x143   :  { %v666_v19 = vadd.f32 %v665_v57, %v2675_v23  ;;  %v667_v13 = vpop.f32.mrb[41].mxu0  ;;  %2070 = vmatprep.subr.bf16.mxu0 %v2241_v9  ;;  %v779_v26 = vadd.f32 %v778_v22, %v2686_v29  ;;  %v780_v38 = vpop.f32.mrb[41].mxu1  ;;  %2134 = vmatprep.subr.bf16.mxu1 %v2243_v28  ;;  %v2248_v57 = vld [vmem:[#allocation2 + $0x98] sm:$0xff]  }
 0x144   :  { %v668_v14 = vadd.f32 %v667_v13, %v2681_v41  ;;  %v669_v40 = vpop.f32.mrb[42].mxu0  ;;  %1229 = vmatprep.mubr.bf16.mxu0 %v906_v50  ;;  %v781_v42 = vadd.f32 %v780_v38, %v2692_v52  ;;  %v782_v47 = vpop.f32.mrb[42].mxu1  ;;  %1326 = vmatprep.mubr.bf16.mxu1 %v908_v16  ;;  %v2249_v16 = vld [vmem:[#allocation2 + $0x60] sm:$0xff]  }
 0x145   :  { %v670_v44 = vadd.f32 %v669_v40, %v2675_v23  ;;  %v671_v49 = vpop.f32.mrb[43].mxu0  ;;  %1230 = vmatmul.mubr.bf16.gmra.mrb[68].mxu0 %v905_v11  ;;  %v855_v51 = vmax.f32 %v779_v26, 0.0  ;;  %v783_v36 = vadd.f32 %v782_v47, %v2686_v29  ;;  %v784_v31 = vpop.f32.mrb[43].mxu1  ;;  %1327 = vmatmul.mubr.bf16.gmra.mrb[68].mxu1 %v907_v21  ;;  %v853_v12 = vmax.f32 %v666_v19, 0.0  ;;  %v2251_v26 = vld [vmem:[#allocation2 + $0xe0] sm:$0xff]  }
 0x146   :  { %v672_v9 = vadd.f32 %v671_v49, %v2681_v41  ;;  %2071 = vmatpush3.bf16.msra.mxu0 %v2242_v10  ;;  %v856_v28 = vmax.f32 %v781_v42, 0.0  ;;  %v785_v50 = vadd.f32 %v784_v31, %v2692_v52  ;;  %2135 = vmatpush3.bf16.msra.mxu1 %v2244_v62  ;;  %v854_v22 = vmax.f32 %v668_v14, 0.0  ;;  %v2250_v19 = vld [vmem:[#allocation2 + $0x20] sm:$0xff]   ;;  %v2253_v14 = vld [vmem:[#allocation2 + $0x68] sm:$0xff]  }
 0x147   :  { %v857_v58 = vmax.f32 %v670_v44, 0.0  ;;  %2072 = vmatprep.subr.bf16.mxu0 %v2245_v33  ;;  %v859_v11 = vmax.f32 %v783_v36, 0.0  ;;  %2136 = vmatprep.subr.bf16.mxu1 %v2247_v24  ;;  %v2252_v33 = vld [vmem:[#allocation2 + $0xa0] sm:$0xff]  }
 0x148   :  { %v858_v13 = vmax.f32 %v672_v9, 0.0  ;;  %v860_v40 = vmax.f32 %v785_v50, 0.0 }
 0x149   :  { %v909_v38 = vpack.c.bf16 %v857_v58, %v853_v12  ;;  %v911_v47 = vpack.c.bf16 %v859_v11, %v855_v51  ;;  %v2255_v51 = vld [vmem:[#allocation2 + $0xe8] sm:$0xff]  }
 0x14a   :  { %v910_v21 = vpack.c.bf16 %v858_v13, %v854_v22  ;;  %v675_v10 = vpop.f32.mrb[44].mxu0  ;;  %2073 = vmatpush3.bf16.msra.mxu0 %v2246_v34  ;;  %v912_v42 = vpack.c.bf16 %v860_v40, %v856_v28  ;;  %v788_v49 = vpop.f32.mrb[44].mxu1  ;;  %2137 = vmatpush3.bf16.msra.mxu1 %v2248_v57  ;;  %v2254_v11 = vld [vmem:[#allocation2 + $0x28] sm:$0xff]  }
 0x14b   :  { %v676_v44 = vadd.f32 %v675_v10, %v2675_v23  ;;  %v677_v62 = vpop.f32.mrb[45].mxu0  ;;  %2074 = vmatprep.subr.bf16.mxu0 %v2249_v16  ;;  %v789_v36 = vadd.f32 %v788_v49, %v2686_v29  ;;  %v790_v9 = vpop.f32.mrb[45].mxu1  ;;  %2138 = vmatprep.subr.bf16.mxu1 %v2251_v26  ;;  %v2256_v10 = vld [vmem:[#allocation2 + $0xa8] sm:$0xff]  }
 0x14c   :  { %v678_v24 = vadd.f32 %v677_v62, %v2681_v41  ;;  %v679_v31 = vpop.f32.mrb[46].mxu0  ;;  %1237 = vmatprep.mubr.bf16.mxu0 %v910_v21  ;;  %v791_v34 = vadd.f32 %v790_v9, %v2692_v52  ;;  %v792_v28 = vpop.f32.mrb[46].mxu1  ;;  %1334 = vmatprep.mubr.bf16.mxu1 %v912_v42  ;;  %v2257_v42 = vld [vmem:[#allocation2 + $0x70] sm:$0xff]  }
 0x14d   :  { %v680_v12 = vadd.f32 %v679_v31, %v2675_v23  ;;  %v681_v58 = vpop.f32.mrb[47].mxu0  ;;  %1238 = vmatmul.mubr.bf16.gmra.mrb[72].mxu0 %v909_v38  ;;  %v863_v50 = vmax.f32 %v789_v36, 0.0  ;;  %v793_v57 = vadd.f32 %v792_v28, %v2686_v29  ;;  %v794_v22 = vpop.f32.mrb[47].mxu1  ;;  %1335 = vmatmul.mubr.bf16.gmra.mrb[72].mxu1 %v911_v47  ;;  %v861_v13 = vmax.f32 %v676_v44, 0.0  ;;  %v2259_v36 = vld [vmem:[#allocation2 + $0xf0] sm:$0xff]  }
 0x14e   :  { %v682_v16 = vadd.f32 %v681_v58, %v2681_v41  ;;  %2075 = vmatpush3.bf16.msra.mxu0 %v2250_v19  ;;  %v864_v26 = vmax.f32 %v791_v34, 0.0  ;;  %v795_v21 = vadd.f32 %v794_v22, %v2692_v52  ;;  %2139 = vmatpush3.bf16.msra.mxu1 %v2252_v33  ;;  %v862_v49 = vmax.f32 %v678_v24, 0.0  ;;  %v2258_v44 = vld [vmem:[#allocation2 + $0x30] sm:$0xff]   ;;  %v2261_v24 = vld [vmem:[#allocation2 + $0x78] sm:$0xff]  }
 0x14f   :  { %v865_v40 = vmax.f32 %v680_v12, 0.0  ;;  %2076 = vmatprep.subr.bf16.mxu0 %v2253_v14  ;;  %v867_v38 = vmax.f32 %v793_v57, 0.0  ;;  %2140 = vmatprep.subr.bf16.mxu1 %v2255_v51  ;;  %v2260_v14 = vld [vmem:[#allocation2 + $0xb0] sm:$0xff]  }
 0x150   :  { %v866_v62 = vmax.f32 %v682_v16, 0.0  ;;  %v868_v31 = vmax.f32 %v795_v21, 0.0 }
 0x151   :  { %v913_v9 = vpack.c.bf16 %v865_v40, %v861_v13  ;;  %v915_v28 = vpack.c.bf16 %v867_v38, %v863_v50  ;;  %v2263_v50 = vld [vmem:[#allocation2 + $0xf8] sm:$0xff]  }
 0x152   :  { %v914_v47 = vpack.c.bf16 %v866_v62, %v862_v49  ;;  %v685_v19 = vpop.f32.mrb[48].mxu0  ;;  %2077 = vmatpush3.bf16.msra.mxu0 %v2254_v11  ;;  %v916_v34 = vpack.c.bf16 %v868_v31, %v864_v26  ;;  %v798_v58 = vpop.f32.mrb[48].mxu1  ;;  %2141 = vmatpush3.bf16.msra.mxu1 %v2256_v10  ;;  %v2262_v38 = vld [vmem:[#allocation2 + $0x38] sm:$0xff]  }
 0x153   :  { %v686_v12 = vadd.f32 %v685_v19, %v2675_v23  ;;  %v687_v33 = vpop.f32.mrb[49].mxu0  ;;  %2078 = vmatprep.subr.bf16.mxu0 %v2257_v42  ;;  %v799_v57 = vadd.f32 %v798_v58, %v2686_v29  ;;  %v800_v16 = vpop.f32.mrb[49].mxu1  ;;  %2142 = vmatprep.subr.bf16.mxu1 %v2259_v36  ;;  %v2264_v19 = vld [vmem:[#allocation2 + $0xb8] sm:$0xff]  }
 0x154   :  { %v688_v51 = vadd.f32 %v687_v33, %v2681_v41  ;;  %v689_v22 = vpop.f32.mrb[50].mxu0  ;;  %1245 = vmatprep.mubr.bf16.mxu0 %v914_v47  ;;  %v801_v11 = vadd.f32 %v800_v16, %v2692_v52  ;;  %v802_v26 = vpop.f32.mrb[50].mxu1  ;;  %1342 = vmatprep.mubr.bf16.mxu1 %v916_v34 }
 0x155   :  { %v690_v13 = vadd.f32 %v689_v22, %v2675_v23  ;;  %v691_v40 = vpop.f32.mrb[51].mxu0  ;;  %1246 = vmatmul.mubr.bf16.gmra.mrb[76].mxu0 %v913_v9  ;;  %v871_v21 = vmax.f32 %v799_v57, 0.0  ;;  %v803_v10 = vadd.f32 %v802_v26, %v2686_v29  ;;  %v804_v49 = vpop.f32.mrb[51].mxu1  ;;  %1343 = vmatmul.mubr.bf16.gmra.mrb[76].mxu1 %v915_v28  ;;  %v869_v62 = vmax.f32 %v686_v12, 0.0 }
 0x156   :  { %v692_v42 = vadd.f32 %v691_v40, %v2681_v41  ;;  %2079 = vmatpush3.bf16.msra.mxu0 %v2258_v44  ;;  %v872_v36 = vmax.f32 %v801_v11, 0.0  ;;  %v805_v47 = vadd.f32 %v804_v49, %v2692_v52  ;;  %2143 = vmatpush3.bf16.msra.mxu1 %v2260_v14  ;;  %v870_v34 = vmax.f32 %v688_v51, 0.0 }
 0x157   :  { %v873_v31 = vmax.f32 %v690_v13, 0.0  ;;  %2080 = vmatprep.subr.bf16.mxu0 %v2261_v24  ;;  %v875_v58 = vmax.f32 %v803_v10, 0.0  ;;  %2144 = vmatprep.subr.bf16.mxu1 %v2263_v50 }
 0x158   :  { %v874_v9 = vmax.f32 %v692_v42, 0.0  ;;  %v876_v57 = vmax.f32 %v805_v47, 0.0 }
 0x159   :  { %v917_v33 = vpack.c.bf16 %v873_v31, %v869_v62  ;;  %v919_v16 = vpack.c.bf16 %v875_v58, %v871_v21 }
 0x15a   :  { %v918_v22 = vpack.c.bf16 %v874_v9, %v870_v34  ;;  %v695_v26 = vpop.f32.mrb[52].mxu0  ;;  %2081 = vmatpush3.bf16.msra.mxu0 %v2262_v38  ;;  %v920_v28 = vpack.c.bf16 %v876_v57, %v872_v36  ;;  %v808_v12 = vpop.f32.mrb[52].mxu1  ;;  %2145 = vmatpush3.bf16.msra.mxu1 %v2264_v19 }
 0x15b   :  { %v696_v44 = vadd.f32 %v695_v26, %v2675_v23  ;;  %v697_v11 = vpop.f32.mrb[53].mxu0  ;;  %v809_v14 = vadd.f32 %v808_v12, %v2686_v29  ;;  %v810_v51 = vpop.f32.mrb[53].mxu1 }
 0x15c   :  { %v698_v24 = vadd.f32 %v697_v11, %v2681_v41  ;;  %v699_v13 = vpop.f32.mrb[54].mxu0  ;;  %1253 = vmatprep.mubr.bf16.mxu0 %v918_v22  ;;  %v811_v50 = vadd.f32 %v810_v51, %v2692_v52  ;;  %v812_v21 = vpop.f32.mrb[54].mxu1  ;;  %1350 = vmatprep.mubr.bf16.mxu1 %v920_v28 }
 0x15d   :  { %v700_v40 = vadd.f32 %v699_v13, %v2675_v23  ;;  %v701_v10 = vpop.f32.mrb[55].mxu0  ;;  %1254 = vmatmul.mubr.bf16.gmra.mrb[80].mxu0 %v917_v33  ;;  %v879_v42 = vmax.f32 %v809_v14, 0.0  ;;  %v813_v49 = vadd.f32 %v812_v21, %v2686_v29  ;;  %v814_v62 = vpop.f32.mrb[55].mxu1  ;;  %1351 = vmatmul.mubr.bf16.gmra.mrb[80].mxu1 %v919_v16  ;;  %v877_v36 = vmax.f32 %v696_v44, 0.0 }
 0x15e   :  { %v702_v38 = vadd.f32 %v701_v10, %v2681_v41  ;;  %v880_v31 = vmax.f32 %v811_v50, 0.0  ;;  %v815_v19 = vadd.f32 %v814_v62, %v2692_v52  ;;  %v878_v34 = vmax.f32 %v698_v24, 0.0 }
 0x15f   :  { %v881_v47 = vmax.f32 %v700_v40, 0.0  ;;  %v883_v58 = vmax.f32 %v813_v49, 0.0 }
 0x160   :  { %v882_v9 = vmax.f32 %v702_v38, 0.0  ;;  %v884_v22 = vmax.f32 %v815_v19, 0.0 }
 0x161   :  { %v921_v57 = vpack.c.bf16 %v881_v47, %v877_v36  ;;  %v923_v26 = vpack.c.bf16 %v883_v58, %v879_v42 }
 0x162   :  { %v922_v28 = vpack.c.bf16 %v882_v9, %v878_v34  ;;  %v705_v33 = vpop.f32.mrb[56].mxu0  ;;  %v924_v12 = vpack.c.bf16 %v884_v22, %v880_v31  ;;  %v818_v14 = vpop.f32.mrb[56].mxu1 }
 0x163   :  { %v706_v11 = vadd.f32 %v705_v33, %v2675_v23  ;;  %v707_v51 = vpop.f32.mrb[57].mxu0  ;;  %v819_v16 = vadd.f32 %v818_v14, %v2686_v29  ;;  %v820_v13 = vpop.f32.mrb[57].mxu1 }
 0x164   :  { %v708_v44 = vadd.f32 %v707_v51, %v2681_v41  ;;  %v709_v50 = vpop.f32.mrb[58].mxu0  ;;  %1261 = vmatprep.mubr.bf16.mxu0 %v922_v28  ;;  %v821_v24 = vadd.f32 %v820_v13, %v2692_v52  ;;  %v822_v21 = vpop.f32.mrb[58].mxu1  ;;  %1358 = vmatprep.mubr.bf16.mxu1 %v924_v12 }
 0x165   :  { %v710_v40 = vadd.f32 %v709_v50, %v2675_v23  ;;  %v711_v10 = vpop.f32.mrb[59].mxu0  ;;  %1262 = vmatmul.mubr.bf16.gmra.mrb[84].mxu0 %v921_v57  ;;  %v887_v42 = vmax.f32 %v819_v16, 0.0  ;;  %v823_v49 = vadd.f32 %v822_v21, %v2686_v29  ;;  %v824_v62 = vpop.f32.mrb[59].mxu1  ;;  %1359 = vmatmul.mubr.bf16.gmra.mrb[84].mxu1 %v923_v26  ;;  %v885_v36 = vmax.f32 %v706_v11, 0.0 }
 0x166   :  { %v712_v38 = vadd.f32 %v711_v10, %v2681_v41  ;;  %v888_v31 = vmax.f32 %v821_v24, 0.0  ;;  %v825_v19 = vadd.f32 %v824_v62, %v2692_v52  ;;  %v886_v34 = vmax.f32 %v708_v44, 0.0 }
 0x167   :  { %v889_v47 = vmax.f32 %v710_v40, 0.0  ;;  %v891_v58 = vmax.f32 %v823_v49, 0.0 }
 0x168   :  { %v890_v9 = vmax.f32 %v712_v38, 0.0  ;;  %v892_v28 = vmax.f32 %v825_v19, 0.0 }
 0x169   :  { %v925_v22 = vpack.c.bf16 %v889_v47, %v885_v36  ;;  %v927_v33 = vpack.c.bf16 %v891_v58, %v887_v42 }
 0x16a   :  { %v926_v12 = vpack.c.bf16 %v890_v9, %v886_v34  ;;  %v715_v57 = vpop.f32.mrb[60].mxu0  ;;  %v928_v14 = vpack.c.bf16 %v892_v28, %v888_v31  ;;  %v828_v16 = vpop.f32.mrb[60].mxu1 }
 0x16b   :  { %v716_v51 = vadd.f32 %v715_v57, %v2675_v23  ;;  %v717_v13 = vpop.f32.mrb[61].mxu0  ;;  %v829_v26 = vadd.f32 %v828_v16, %v2686_v29  ;;  %v830_v50 = vpop.f32.mrb[61].mxu1 }
 0x16c   :  { %v718_v11 = vadd.f32 %v717_v13, %v2681_v41  ;;  %v719_v24 = vpop.f32.mrb[62].mxu0  ;;  %1269 = vmatprep.mubr.bf16.mxu0 %v926_v12  ;;  %v831_v44 = vadd.f32 %v830_v50, %v2692_v52  ;;  %v832_v21 = vpop.f32.mrb[62].mxu1  ;;  %1366 = vmatprep.mubr.bf16.mxu1 %v928_v14 }
 0x16d   :  { %v720_v40 = vadd.f32 %v719_v24, %v2675_v23  ;;  %v721_v10 = vpop.f32.mrb[63].mxu0  ;;  %1270 = vmatmul.mubr.bf16.gmra.mrb[88].mxu0 %v925_v22  ;;  %v895_v42 = vmax.f32 %v829_v26, 0.0  ;;  %v833_v49 = vadd.f32 %v832_v21, %v2686_v29  ;;  %v834_v62 = vpop.f32.mrb[63].mxu1  ;;  %1367 = vmatmul.mubr.bf16.gmra.mrb[88].mxu1 %v927_v33  ;;  %v893_v36 = vmax.f32 %v716_v51, 0.0 }
 0x16e   :  { %v722_v38 = vadd.f32 %v721_v10, %v2681_v41  ;;  %v896_v31 = vmax.f32 %v831_v44, 0.0  ;;  %v835_v19 = vadd.f32 %v834_v62, %v2692_v52  ;;  %v894_v34 = vmax.f32 %v718_v11, 0.0 }
 0x16f   :  { %v897_v47 = vmax.f32 %v720_v40, 0.0  ;;  %v899_v58 = vmax.f32 %v833_v49, 0.0 }
 0x170   :  { %v898_v9 = vmax.f32 %v722_v38, 0.0  ;;  %v900_v28 = vmax.f32 %v835_v19, 0.0 }
 0x171   :  { %v929_v23 = vpack.c.bf16 %v897_v47, %v893_v36  ;;  %v931_v12 = vpack.c.bf16 %v899_v58, %v895_v42 }
 0x172   :  { %v930_v57 = vpack.c.bf16 %v898_v9, %v894_v34  ;;  %v932_v22 = vpack.c.bf16 %v900_v28, %v896_v31 }
 0x174   :  { %1277 = vmatprep.mubr.bf16.mxu0 %v930_v57  ;;  %1374 = vmatprep.mubr.bf16.mxu1 %v932_v22 }
 0x175   :  { %1278 = vmatmul.mubr.bf16.gmra.mrb[92].mxu0 %v929_v23  ;;  %1375 = vmatmul.mubr.bf16.gmra.mrb[92].mxu1 %v931_v12 }
 0x176   :  { %1607 = vmatprep.mubr.bf16.mxu0 %v2565_v1  ;;  %1704 = vmatprep.mubr.bf16.mxu1 %v2567_v3 }
 0x17d   :  { %1608 = vmatmul.mubr.bf16.vlgmr.msra.gmra.mrb[96].mxu0 %v2561_v61  ;;  %1705 = vmatmul.mubr.bf16.vlgmr.msra.gmra.mrb[96].mxu1 %v2563_v63 }
 0x17e   :  { %1615 = vmatprep.mubr.bf16.mxu0 %v2581_v30  ;;  %1712 = vmatprep.mubr.bf16.mxu1 %v2583_v39 }
 0x185   :  { %1616 = vmatmul.mubr.bf16.gmra.mrb[100].mxu0 %v2577_v25  ;;  %1713 = vmatmul.mubr.bf16.gmra.mrb[100].mxu1 %v2579_v27 }
 0x186   :  { %1623 = vmatprep.mubr.bf16.mxu0 %v2597_v6  ;;  %1720 = vmatprep.mubr.bf16.mxu1 %v2599_v8 }
 0x18d   :  { %1624 = vmatmul.mubr.bf16.gmra.mrb[104].mxu0 %v2593_v2  ;;  %1721 = vmatmul.mubr.bf16.gmra.mrb[104].mxu1 %v2595_v5 }
 0x18e   :  { %1631 = vmatprep.mubr.bf16.mxu0 %v2613_v46  ;;  %1728 = vmatprep.mubr.bf16.mxu1 %v2615_v48 }
 0x195   :  { %1632 = vmatmul.mubr.bf16.gmra.mrb[108].mxu0 %v2609_v43  ;;  %1729 = vmatmul.mubr.bf16.gmra.mrb[108].mxu1 %v2611_v45 }
 0x196   :  { %1639 = vmatprep.mubr.bf16.mxu0 %v2629_v18  ;;  %1736 = vmatprep.mubr.bf16.mxu1 %v2631_v20 }
 0x19d   :  { %1640 = vmatmul.mubr.bf16.gmra.mrb[112].mxu0 %v2625_v15  ;;  %1737 = vmatmul.mubr.bf16.gmra.mrb[112].mxu1 %v2627_v17 }
 0x19e   :  { %1647 = vmatprep.mubr.bf16.mxu0 %v2645_v7  ;;  %1744 = vmatprep.mubr.bf16.mxu1 %v2647_v0 }
 0x1a5   :  { %1648 = vmatmul.mubr.bf16.gmra.mrb[116].mxu0 %v2641_v60  ;;  %1745 = vmatmul.mubr.bf16.gmra.mrb[116].mxu1 %v2643_v4 }
 0x1a6   :  { %1655 = vmatprep.mubr.bf16.mxu0 %v2661_v56  ;;  %1752 = vmatprep.mubr.bf16.mxu1 %v2666_v59 }
 0x1ad   :  { %1656 = vmatmul.mubr.bf16.gmra.mrb[120].mxu0 %v2657_v53  ;;  %1753 = vmatmul.mubr.bf16.gmra.mrb[120].mxu1 %v2659_v55 }
 0x1ae   :  { %1663 = vmatprep.mubr.bf16.mxu0 %v2696_v54  ;;  %1760 = vmatprep.mubr.bf16.mxu1 %v2698_v37 }
 0x1b5   :  { %1664 = vmatmul.mubr.bf16.gmra.mrb[124].mxu0 %v2688_v35  ;;  %1761 = vmatmul.mubr.bf16.gmra.mrb[124].mxu1 %v2694_v32 }
 0x210   :  { %v1954_v61 = vpop.f32.mrb[64].mxu0  ;;  %v2018_v63 = vpop.f32.mrb[64].mxu1 }
 0x211   :  { %v1955_v1 = vpop.f32.mrb[65].mxu0  ;;  %v2019_v25 = vpop.f32.mrb[65].mxu1 }
 0x212   :  { %v1956_v3 = vadd.f32 %v1955_v1, %v1954_v61  ;;  %v1957_v27 = vpop.f32.mrb[66].mxu0  ;;  %v2020_v30 = vadd.f32 %v2019_v25, %v2018_v63  ;;  %v2021_v39 = vpop.f32.mrb[66].mxu1 }
 0x213   :  { %v1958_v2 = vpop.f32.mrb[67].mxu0  ;;  %v2022_v6 = vpop.f32.mrb[67].mxu1 }
 0x214   :  { %v1959_v5 = vadd.f32 %v1958_v2, %v1957_v27  ;;  %v2796_v8 = vadd.f32 %v2020_v30, %v1956_v3  ;;  %v2023_v43 = vadd.f32 %v2022_v6, %v2021_v39 }
 0x216   :  { %v2798_v45 = vadd.f32 %v2023_v43, %v1959_v5 }
 0x218   :  { %v1960_v46 = vpop.f32.mrb[68].mxu0  ;;  %v2024_v48 = vpop.f32.mrb[68].mxu1 }
 0x219   :  { %v1961_v15 = vpop.f32.mrb[69].mxu0  ;;  %v2025_v18 = vpop.f32.mrb[69].mxu1 }
 0x21a   :  { %v1962_v17 = vadd.f32 %v1961_v15, %v1960_v46  ;;  %v1963_v20 = vpop.f32.mrb[70].mxu0  ;;  %v2026_v60 = vadd.f32 %v2025_v18, %v2024_v48  ;;  %v2027_v4 = vpop.f32.mrb[70].mxu1 }
 0x21b   :  { %v1964_v7 = vpop.f32.mrb[71].mxu0  ;;  %v2028_v53 = vpop.f32.mrb[71].mxu1 }
 0x21c   :  { %v1965_v0 = vadd.f32 %v1964_v7, %v1963_v20  ;;  %v2800_v55 = vadd.f32 %v2026_v60, %v1962_v17  ;;  %v2029_v56 = vadd.f32 %v2028_v53, %v2027_v4 }
 0x21e   :  { %v2802_v59 = vadd.f32 %v2029_v56, %v1965_v0 }
 0x220   :  { %v1966_v41 = vpop.f32.mrb[72].mxu0  ;;  %v2030_v29 = vpop.f32.mrb[72].mxu1 }
 0x221   :  { %v1967_v35 = vpop.f32.mrb[73].mxu0  ;;  %v2031_v32 = vpop.f32.mrb[73].mxu1 }
 0x222   :  { %v1968_v52 = vadd.f32 %v1967_v35, %v1966_v41  ;;  %v1969_v54 = vpop.f32.mrb[74].mxu0  ;;  %v2032_v37 = vadd.f32 %v2031_v32, %v2030_v29  ;;  %v2033_v33 = vpop.f32.mrb[74].mxu1 }
 0x223   :  { %v1970_v14 = vpop.f32.mrb[75].mxu0  ;;  %v2034_v16 = vpop.f32.mrb[75].mxu1 }
 0x224   :  { %v1971_v51 = vadd.f32 %v1970_v14, %v1969_v54  ;;  %v2804_v13 = vadd.f32 %v2032_v37, %v1968_v52  ;;  %v2035_v26 = vadd.f32 %v2034_v16, %v2033_v33 }
 0x226   :  { %v2806_v11 = vadd.f32 %v2035_v26, %v1971_v51 }
 0x228   :  { %v1972_v50 = vpop.f32.mrb[76].mxu0  ;;  %v2036_v24 = vpop.f32.mrb[76].mxu1 }
 0x229   :  { %v1973_v44 = vpop.f32.mrb[77].mxu0  ;;  %v2037_v21 = vpop.f32.mrb[77].mxu1 }
 0x22a   :  { %v1974_v40 = vadd.f32 %v1973_v44, %v1972_v50  ;;  %v1975_v10 = vpop.f32.mrb[78].mxu0  ;;  %v2038_v42 = vadd.f32 %v2037_v21, %v2036_v24  ;;  %v2039_v49 = vpop.f32.mrb[78].mxu1 }
 0x22b   :  { %v1976_v38 = vpop.f32.mrb[79].mxu0  ;;  %v2040_v36 = vpop.f32.mrb[79].mxu1 }
 0x22c   :  { %v1977_v62 = vadd.f32 %v1976_v38, %v1975_v10  ;;  %v2808_v31 = vadd.f32 %v2038_v42, %v1974_v40  ;;  %v2041_v47 = vadd.f32 %v2040_v36, %v2039_v49 }
 0x22e   :  { %v2810_v19 = vadd.f32 %v2041_v47, %v1977_v62 }
 0x230   :  { %v1978_v34 = vpop.f32.mrb[80].mxu0  ;;  %v2042_v58 = vpop.f32.mrb[80].mxu1 }
 0x231   :  { %v1979_v9 = vpop.f32.mrb[81].mxu0  ;;  %v2043_v28 = vpop.f32.mrb[81].mxu1 }
 0x232   :  { %v1980_v23 = vadd.f32 %v1979_v9, %v1978_v34  ;;  %v1981_v12 = vpop.f32.mrb[82].mxu0  ;;  %v2044_v57 = vadd.f32 %v2043_v28, %v2042_v58  ;;  %v2045_v22 = vpop.f32.mrb[82].mxu1 }
 0x233   :  { %v1982_v61 = vpop.f32.mrb[83].mxu0  ;;  %v2046_v1 = vpop.f32.mrb[83].mxu1 }
 0x234   :  { %v1983_v63 = vadd.f32 %v1982_v61, %v1981_v12  ;;  %v2812_v3 = vadd.f32 %v2044_v57, %v1980_v23  ;;  %v2047_v25 = vadd.f32 %v2046_v1, %v2045_v22 }
 0x236   :  { %v2814_v27 = vadd.f32 %v2047_v25, %v1983_v63 }
 0x238   :  { %v1984_v30 = vpop.f32.mrb[84].mxu0  ;;  %v2048_v39 = vpop.f32.mrb[84].mxu1 }
 0x239   :  { %v1985_v2 = vpop.f32.mrb[85].mxu0  ;;  %v2049_v6 = vpop.f32.mrb[85].mxu1 }
 0x23a   :  { %v1986_v5 = vadd.f32 %v1985_v2, %v1984_v30  ;;  %v1987_v43 = vpop.f32.mrb[86].mxu0  ;;  %v2050_v46 = vadd.f32 %v2049_v6, %v2048_v39  ;;  %v2051_v48 = vpop.f32.mrb[86].mxu1  ;;  %v2832_v30 = vld [vmem:[%s2881_s4] ss:$0 sm:$0xff]  ;;  %s2317_s4 = smov [#allocation5]  }
 0x23b   :  { %v1988_v15 = vpop.f32.mrb[87].mxu0  ;;  %v2052_v18 = vpop.f32.mrb[87].mxu1  ;;  %s1813_s20 = sshll.u32 %s2317_s4, 4  ;;  %s1814_s20 = int_to_ptr.vmem [resolvable:$true] %s1813_s20 }
 0x23c   :  { %v1989_v17 = vadd.f32 %v1988_v15, %v1987_v43  ;;  %v2816_v20 = vadd.f32 %v2050_v46, %v1986_v5  ;;  %v2053_v60 = vadd.f32 %v2052_v18, %v2051_v48  ;;  %s2287_s21 = scalar_lea.vmem %s1814_s20, 2048  ;;  %p2292_p9 = scmp.lt.s32.totalorder %s1814_s20, %s1814_s20 }
 0x23d   :  { %p2288_p8 = scmp.ne.s32.totalorder %s1814_s20, %s2287_s21  ;;  %p2293_p10 = scmp.lt.s32.totalorder %s2287_s21, %s2287_s21 }
 0x23e   :  { %v2818_v4 = vadd.f32 %v2053_v60, %v1989_v17 }
 0x23f   :  { %p2294_p11 = por %p2293_p10, %p2292_p9 }
 0x240   :  { %v1990_v7 = vpop.f32.mrb[88].mxu0  ;;  %v2054_v0 = vpop.f32.mrb[88].mxu1 }
 0x241   :  { %v1991_v53 = vpop.f32.mrb[89].mxu0  ;;  %v2055_v41 = vpop.f32.mrb[89].mxu1  ;;  %p2295_p12 = pnand %p2294_p11, %p2288_p8 }
 0x242   :  { %v1992_v56 = vadd.f32 %v1991_v53, %v1990_v7  ;;  %v1993_v29 = vpop.f32.mrb[90].mxu0  ;;  %v2056_v35 = vadd.f32 %v2055_v41, %v2054_v0  ;;  %v2057_v52 = vpop.f32.mrb[90].mxu1 }
 0x243   :  { %v1994_v32 = vpop.f32.mrb[91].mxu0  ;;  %v2058_v37 = vpop.f32.mrb[91].mxu1 }
 0x244   :  { %v1995_v54 = vadd.f32 %v1994_v32, %v1993_v29  ;;  %v2820_v33 = vadd.f32 %v2056_v35, %v1992_v56  ;;  %v2059_v14 = vadd.f32 %v2058_v37, %v2057_v52 }
 0x246   :  { %v2822_v51 = vadd.f32 %v2059_v14, %v1995_v54 }
 0x248   :  { %v1996_v16 = vpop.f32.mrb[92].mxu0  ;;  %v2060_v26 = vpop.f32.mrb[92].mxu1 }
 0x249   :  { %v1997_v50 = vpop.f32.mrb[93].mxu0  ;;  %v2061_v44 = vpop.f32.mrb[93].mxu1 }
 0x24a   :  { %v1998_v24 = vadd.f32 %v1997_v50, %v1996_v16  ;;  %v1999_v40 = vpop.f32.mrb[94].mxu0  ;;  %v2062_v21 = vadd.f32 %v2061_v44, %v2060_v26  ;;  %v2063_v10 = vpop.f32.mrb[94].mxu1 }
 0x24b   :  { %v2000_v42 = vpop.f32.mrb[95].mxu0  ;;  %v2064_v38 = vpop.f32.mrb[95].mxu1 }
 0x24c   :  { %v2001_v49 = vadd.f32 %v2000_v42, %v1999_v40  ;;  %v2824_v62 = vadd.f32 %v2062_v21, %v1998_v24  ;;  %v2065_v36 = vadd.f32 %v2064_v38, %v2063_v10 }
 0x24e   :  { %v2826_v47 = vadd.f32 %v2065_v36, %v2001_v49 }
 0x250   :  { %v2082_v34 = vpop.f32.mrb[96].mxu0  ;;  %v2146_v58 = vpop.f32.mrb[96].mxu1 }
 0x251   :  { %v2083_v9 = vpop.f32.mrb[97].mxu0  ;;  %v2147_v28 = vpop.f32.mrb[97].mxu1 }
 0x252   :  { %v2084_v23 = vadd.f32 %v2083_v9, %v2082_v34  ;;  %v2085_v12 = vpop.f32.mrb[98].mxu0  ;;  %v2148_v57 = vadd.f32 %v2147_v28, %v2146_v58  ;;  %v2149_v22 = vpop.f32.mrb[98].mxu1 }
 0x253   :  { %v2086_v61 = vpop.f32.mrb[99].mxu0  ;;  %v2150_v25 = vpop.f32.mrb[99].mxu1 }
 0x254   :  { %v1610_v63 = vadd.f32 %v2084_v23, %v2796_v8  ;;  %v2087_v1 = vadd.f32 %v2086_v61, %v2085_v12  ;;  %v2151_v39 = vadd.f32 %v2150_v25, %v2149_v22 }
 0x256   :  { %v1707_v2 = vadd.f32 %v2148_v57, %v1610_v63  ;;  %v1613_v5 = vadd.f32 %v2087_v1, %v2798_v45 }
 0x258   :  { %v1776_v6 = vadd.f32 %v2832_v30, %v1707_v2  ;;  %v1710_v43 = vadd.f32 %v2151_v39, %v1613_v5  ;;  %v2088_v46 = vpop.f32.mrb[100].mxu0  ;;  %v2152_v48 = vpop.f32.mrb[100].mxu1 }
 0x259   :  { %v2089_v15 = vpop.f32.mrb[101].mxu0  ;;  %v2153_v18 = vpop.f32.mrb[101].mxu1 }
 0x25a   :  { %1792 = vst [vmem:[#allocation5] sm:$0xff] %v1776_v6  ;;  %v1777_v8 = vadd.f32 %v2832_v30, %v1710_v43  ;;  %v2090_v17 = vadd.f32 %v2089_v15, %v2088_v46  ;;  %v2091_v60 = vpop.f32.mrb[102].mxu0  ;;  %v2154_v7 = vadd.f32 %v2153_v18, %v2152_v48  ;;  %v2155_v0 = vpop.f32.mrb[102].mxu1 }
 0x25b   :  { %v2092_v53 = vpop.f32.mrb[103].mxu0  ;;  %v2156_v45 = vpop.f32.mrb[103].mxu1 }
 0x25c   :  { %1793 = vst [vmem:[#allocation5 + $0x8] sm:$0xff] %v1777_v8  ;;  %v1618_v56 = vadd.f32 %v2090_v17, %v2800_v55  ;;  %v2093_v41 = vadd.f32 %v2092_v53, %v2091_v60  ;;  %v2157_v29 = vadd.f32 %v2156_v45, %v2155_v0 }
 0x25e   :  { %v1715_v35 = vadd.f32 %v2154_v7, %v1618_v56  ;;  %v1621_v52 = vadd.f32 %v2093_v41, %v2802_v59 }
 0x260   :  { %v1778_v32 = vadd.f32 %v2832_v30, %v1715_v35  ;;  %v1718_v54 = vadd.f32 %v2157_v29, %v1621_v52  ;;  %v2094_v37 = vpop.f32.mrb[104].mxu0  ;;  %v2158_v14 = vpop.f32.mrb[104].mxu1 }
 0x261   :  { %v2095_v16 = vpop.f32.mrb[105].mxu0  ;;  %v2159_v24 = vpop.f32.mrb[105].mxu1 }
 0x262   :  { %1794 = vst [vmem:[#allocation5 + $0x10] sm:$0xff] %v1778_v32  ;;  %v1779_v26 = vadd.f32 %v2832_v30, %v1718_v54  ;;  %v2096_v50 = vadd.f32 %v2095_v16, %v2094_v37  ;;  %v2097_v44 = vpop.f32.mrb[106].mxu0  ;;  %v2160_v40 = vadd.f32 %v2159_v24, %v2158_v14  ;;  %v2161_v55 = vpop.f32.mrb[106].mxu1 }
 0x263   :  { %v2098_v21 = vpop.f32.mrb[107].mxu0  ;;  %v2162_v59 = vpop.f32.mrb[107].mxu1 }
 0x264   :  { %1795 = vst [vmem:[#allocation5 + $0x18] sm:$0xff] %v1779_v26  ;;  %v1626_v10 = vadd.f32 %v2096_v50, %v2804_v13  ;;  %v2099_v42 = vadd.f32 %v2098_v21, %v2097_v44  ;;  %v2163_v49 = vadd.f32 %v2162_v59, %v2161_v55 }
 0x266   :  { %v1723_v38 = vadd.f32 %v2160_v40, %v1626_v10  ;;  %v1629_v36 = vadd.f32 %v2099_v42, %v2806_v11 }
 0x268   :  { %v1780_v34 = vadd.f32 %v2832_v30, %v1723_v38  ;;  %v1726_v58 = vadd.f32 %v2163_v49, %v1629_v36  ;;  %v2100_v9 = vpop.f32.mrb[108].mxu0  ;;  %v2164_v23 = vpop.f32.mrb[108].mxu1 }
 0x269   :  { %v2101_v28 = vpop.f32.mrb[109].mxu0  ;;  %v2165_v22 = vpop.f32.mrb[109].mxu1 }
 0x26a   :  { %1796 = vst [vmem:[#allocation5 + $0x20] sm:$0xff] %v1780_v34  ;;  %v1781_v12 = vadd.f32 %v2832_v30, %v1726_v58  ;;  %v2102_v57 = vadd.f32 %v2101_v28, %v2100_v9  ;;  %v2103_v61 = vpop.f32.mrb[110].mxu0  ;;  %v2166_v63 = vadd.f32 %v2165_v22, %v2164_v23  ;;  %v2167_v13 = vpop.f32.mrb[110].mxu1 }
 0x26b   :  { %v2104_v1 = vpop.f32.mrb[111].mxu0  ;;  %v2168_v11 = vpop.f32.mrb[111].mxu1 }
 0x26c   :  { %1797 = vst [vmem:[#allocation5 + $0x28] sm:$0xff] %v1781_v12  ;;  %v1634_v25 = vadd.f32 %v2102_v57, %v2808_v31  ;;  %v2105_v39 = vadd.f32 %v2104_v1, %v2103_v61  ;;  %v2169_v2 = vadd.f32 %v2168_v11, %v2167_v13 }
 0x26e   :  { %v1731_v5 = vadd.f32 %v2166_v63, %v1634_v25  ;;  %v1637_v6 = vadd.f32 %v2105_v39, %v2810_v19 }
 0x270   :  { %v1782_v43 = vadd.f32 %v2832_v30, %v1731_v5  ;;  %v1734_v46 = vadd.f32 %v2169_v2, %v1637_v6  ;;  %v2106_v48 = vpop.f32.mrb[112].mxu0  ;;  %v2170_v15 = vpop.f32.mrb[112].mxu1 }
 0x271   :  { %v2107_v8 = vpop.f32.mrb[113].mxu0  ;;  %v2171_v60 = vpop.f32.mrb[113].mxu1 }
 0x272   :  { %1798 = vst [vmem:[#allocation5 + $0x30] sm:$0xff] %v1782_v43  ;;  %v1783_v17 = vadd.f32 %v2832_v30, %v1734_v46  ;;  %v2108_v18 = vadd.f32 %v2107_v8, %v2106_v48  ;;  %v2109_v7 = vpop.f32.mrb[114].mxu0  ;;  %v2172_v0 = vadd.f32 %v2171_v60, %v2170_v15  ;;  %v2173_v31 = vpop.f32.mrb[114].mxu1 }
 0x273   :  { %v2110_v53 = vpop.f32.mrb[115].mxu0  ;;  %v2174_v19 = vpop.f32.mrb[115].mxu1 }
 0x274   :  { %1799 = vst [vmem:[#allocation5 + $0x38] sm:$0xff] %v1783_v17  ;;  %v1642_v56 = vadd.f32 %v2108_v18, %v2812_v3  ;;  %v2111_v41 = vadd.f32 %v2110_v53, %v2109_v7  ;;  %v2175_v45 = vadd.f32 %v2174_v19, %v2173_v31 }
 0x276   :  { %v1739_v29 = vadd.f32 %v2172_v0, %v1642_v56  ;;  %v1645_v35 = vadd.f32 %v2111_v41, %v2814_v27 }
 0x278   :  { %v1784_v52 = vadd.f32 %v2832_v30, %v1739_v29  ;;  %v1742_v32 = vadd.f32 %v2175_v45, %v1645_v35  ;;  %v2112_v54 = vpop.f32.mrb[116].mxu0  ;;  %v2176_v37 = vpop.f32.mrb[116].mxu1 }
 0x279   :  { %v2113_v14 = vpop.f32.mrb[117].mxu0  ;;  %v2177_v50 = vpop.f32.mrb[117].mxu1 }
 0x27a   :  { %1800 = vst [vmem:[#allocation5 + $0x40] sm:$0xff] %v1784_v52  ;;  %v1785_v16 = vadd.f32 %v2832_v30, %v1742_v32  ;;  %v2114_v26 = vadd.f32 %v2113_v14, %v2112_v54  ;;  %v2115_v24 = vpop.f32.mrb[118].mxu0  ;;  %v2178_v44 = vadd.f32 %v2177_v50, %v2176_v37  ;;  %v2179_v3 = vpop.f32.mrb[118].mxu1 }
 0x27b   :  { %v2116_v40 = vpop.f32.mrb[119].mxu0  ;;  %v2180_v27 = vpop.f32.mrb[119].mxu1 }
 0x27c   :  { %1801 = vst [vmem:[#allocation5 + $0x48] sm:$0xff] %v1785_v16  ;;  %v1650_v55 = vadd.f32 %v2114_v26, %v2816_v20  ;;  %v2117_v21 = vadd.f32 %v2116_v40, %v2115_v24  ;;  %v2181_v10 = vadd.f32 %v2180_v27, %v2179_v3 }
 0x27e   :  { %v1747_v42 = vadd.f32 %v2178_v44, %v1650_v55  ;;  %v1653_v59 = vadd.f32 %v2117_v21, %v2818_v4 }
 0x280   :  { %v1786_v49 = vadd.f32 %v2832_v30, %v1747_v42  ;;  %v1750_v38 = vadd.f32 %v2181_v10, %v1653_v59  ;;  %v2118_v36 = vpop.f32.mrb[120].mxu0  ;;  %v2182_v34 = vpop.f32.mrb[120].mxu1 }
 0x281   :  { %v2119_v58 = vpop.f32.mrb[121].mxu0  ;;  %v2183_v28 = vpop.f32.mrb[121].mxu1 }
 0x282   :  { %1802 = vst [vmem:[#allocation5 + $0x50] sm:$0xff] %v1786_v49  ;;  %v1787_v9 = vadd.f32 %v2832_v30, %v1750_v38  ;;  %v2120_v23 = vadd.f32 %v2119_v58, %v2118_v36  ;;  %v2121_v12 = vpop.f32.mrb[122].mxu0  ;;  %v2184_v57 = vadd.f32 %v2183_v28, %v2182_v34  ;;  %v2185_v20 = vpop.f32.mrb[122].mxu1 }
 0x283   :  { %v2122_v22 = vpop.f32.mrb[123].mxu0  ;;  %v2186_v4 = vpop.f32.mrb[123].mxu1 }
 0x284   :  { %1803 = vst [vmem:[#allocation5 + $0x58] sm:$0xff] %v1787_v9  ;;  %v1658_v61 = vadd.f32 %v2120_v23, %v2820_v33  ;;  %v2123_v63 = vadd.f32 %v2122_v22, %v2121_v12  ;;  %v2187_v13 = vadd.f32 %v2186_v4, %v2185_v20 }
 0x286   :  { %v1755_v1 = vadd.f32 %v2184_v57, %v1658_v61  ;;  %v1661_v25 = vadd.f32 %v2123_v63, %v2822_v51 }
 0x288   :  { %v1788_v39 = vadd.f32 %v2832_v30, %v1755_v1  ;;  %v1758_v11 = vadd.f32 %v2187_v13, %v1661_v25  ;;  %v2124_v2 = vpop.f32.mrb[124].mxu0  ;;  %v2188_v5 = vpop.f32.mrb[124].mxu1 }
 0x289   :  { %v2125_v6 = vpop.f32.mrb[125].mxu0  ;;  %v2189_v48 = vpop.f32.mrb[125].mxu1 }
 0x28a   :  { %1804 = vst [vmem:[#allocation5 + $0x60] sm:$0xff] %v1788_v39  ;;  %v1789_v43 = vadd.f32 %v2832_v30, %v1758_v11  ;;  %v2126_v46 = vadd.f32 %v2125_v6, %v2124_v2  ;;  %v2127_v15 = vpop.f32.mrb[126].mxu0  ;;  %v2190_v8 = vadd.f32 %v2189_v48, %v2188_v5  ;;  %v2191_v33 = vpop.f32.mrb[126].mxu1 }
 0x28b   :  { %v2128_v17 = vpop.f32.mrb[127].mxu0  ;;  %v2192_v51 = vpop.f32.mrb[127].mxu1 }
 0x28c   :  { %1805 = vst [vmem:[#allocation5 + $0x68] sm:$0xff] %v1789_v43  ;;  %v1666_v18 = vadd.f32 %v2126_v46, %v2824_v62  ;;  %v2129_v60 = vadd.f32 %v2128_v17, %v2127_v15  ;;  %v2193_v7 = vadd.f32 %v2192_v51, %v2191_v33 }
 0x28e   :  { %v1763_v0 = vadd.f32 %v2190_v8, %v1666_v18  ;;  %v1669_v31 = vadd.f32 %v2129_v60, %v2826_v47 }
 0x290   :  { %v1790_v53 = vadd.f32 %v2832_v30, %v1763_v0  ;;  %v1766_v56 = vadd.f32 %v2193_v7, %v1669_v31 }
 0x292   :  { %1806 = vst [vmem:[#allocation5 + $0x70] sm:$0xff] %v1790_v53  ;;  %v1791_v41 = vadd.f32 %v2832_v30, %v1766_v56 }
 0x294   :  { %1807 = vst [vmem:[#allocation5 + $0x78] sm:$0xff] %v1791_v41 }
 0x295   :  { %2298 = shalt.err (!%p2295_p12)
}
 0x296   :  { %s2299_s24 = scalar_lea.hbm %s2882_s5, 2048 }
 0x297   :  { %p2300_p13 = scmp.ne.s32.totalorder %s2882_s5, %s2299_s24  ;;  %p2303_p0 = scmp.lt.u32.totalorder %s2299_s24, %s2882_s5 }
 0x299   :  { %p2305_p1 = pnand %p2303_p0, %p2300_p13 }
 0x29b   :  { %2308 = shalt.err (!%p2305_p1)
}
 0x29c   :  { %s2318_s29 = smov 128   ;;  %s2319_s30 = smov 8  }
 0x29d   :  { %1819 = dma.vmem_to_hbm [thread:$0]  %s1814_s20, 2048, %s2882_s5, [#allocation4], %s2318_s29, %s2318_s29, %s2319_s30  }
 0x29e   :  { %2311 = dma.done.wait [#allocation4], 2048  }
 0x29f   :  { %2312 = vsyncadd [#allocation4], 4294965248 }
 0x2a0   :  { %1823 = vsyncpa [#allocation3], 1 }
 0x2a1   :  { %1824 = vsyncpa [#allocation4], 1 }

</bundles_post_ra>
